<compile_context>
chip_gen: v7x
topology: tpu7x:2x2x1
jax: 0.10.0
libtpu: 0.0.40
codegen_flags: <defaults>
</compile_context>

<pallas_src>
import math

import jax
import jax.numpy as jnp
from jax.experimental import pallas as pl
from jax.experimental.pallas import tpu as pltpu


def make_attention_kernel(S, D, H, group, num_kv_heads):
    """One grid step = one batch element; kv groups are unrolled inside."""
    GD = group * D
    KV = num_kv_heads * D
    half = D // 2

    def kernel(x_ref, cosr_ref, sinr_ref, cos_ref, sin_ref, wqkv_ref, wo_ref, o_ref):
        # ---- fused QKV projection: single lane-dense bf16 MXU matmul, f32 acc ----
        qkv = jnp.dot(x_ref[0], wqkv_ref[...],
                      preferred_element_type=jnp.float32)          # (S, H + 2*KV)

        cosr = cosr_ref[...]        # (S*group, D)  pre-replicated in wrapper
        sinr = sinr_ref[...]        # (S*group, D)  sign-folded, pre-replicated
        cos = cos_ref[...]          # (S, D)
        sin = sin_ref[...]          # (S, D)        sign-folded

        # 1/sqrt(D) is already folded into the Wq columns of wqkv (wrapper side).
        ctx_parts = []
        for g in range(num_kv_heads):                               # static, unrolled
            # RoPE: rotate_half == roll by D/2 (XLU); sign lives in the sin table.
            qf = qkv[:, g * GD:(g + 1) * GD].reshape(S * group, D)  # rows = (s, local head)
            qf = qf * cosr + pltpu.roll(qf, shift=half, axis=1) * sinr
            k = qkv[:, H + g * D:H + (g + 1) * D]                   # (S, D)
            k = k * cos + pltpu.roll(k, shift=half, axis=1) * sin
            v = qkv[:, H + KV + g * D:H + KV + (g + 1) * D]         # (S, D)

            qb = qf.astype(jnp.bfloat16)
            kb = k.astype(jnp.bfloat16)
            vb = v.astype(jnp.bfloat16)

            # ---- attention for the whole GQA group as one 2-D matmul pair ----
            scores = jax.lax.dot_general(qb, kb, (((1,), (1,)), ((), ())),
                                         preferred_element_type=jnp.float32)   # (S*group, S)
            m = jnp.max(scores, axis=-1, keepdims=True)
            p = jnp.exp(scores - m)
            denom = jnp.sum(p, axis=-1, keepdims=True)
            ctx = jnp.dot(p.astype(jnp.bfloat16), vb,
                          preferred_element_type=jnp.float32)                   # (S*group, D)
            ctx = ctx * pl.reciprocal(denom, approx=True)                       # EUP divide
            ctx_parts.append(ctx.reshape(S, GD))

        # ---- single (S, H) x (H, H) o_proj MXU matmul ----
        ctx_full = jnp.concatenate(ctx_parts, axis=1).astype(jnp.bfloat16)      # (S, H)
        o_ref[0] = jnp.dot(ctx_full, wo_ref[...],
                           preferred_element_type=jnp.float32).astype(o_ref.dtype)

    return kernel


def prepare_attention_params(cos, sin, wq_t, wk_t, wv_t, wo_t, num_heads, num_kv_heads):
    """One-time prep (NOT per forward call): fuse + cast weights to bf16, fold the
    1/sqrt(D) softmax scale into Wq, sign-fold sin for the roll-based rotate_half,
    and pre-replicate the RoPE tables for the (S*group, D) q-slab row layout."""
    H = wq_t.shape[0]
    D = H // num_heads
    group = num_heads // num_kv_heads
    scale = 1.0 / math.sqrt(D)

    # Fused [Wq*scale | Wk | Wv]; RoPE is linear, so pre-scaling Wq is exact.
    wqkv = jnp.concatenate([wq_t * scale, wk_t, wv_t], axis=1).astype(jnp.bfloat16)
    wo_b = wo_t.astype(jnp.bfloat16)

    # rotate_half sign folded into sin (first half negated).
    sin_signed = jnp.concatenate([-sin[:, :D // 2], sin[:, D // 2:]], axis=-1)

    # Pre-replicated tables for the q slab's (S*group, D) layout (row = s*group + h).
    cos_r = jnp.repeat(cos, group, axis=0)
    sin_r = jnp.repeat(sin_signed, group, axis=0)

    return dict(wqkv=wqkv, wo=wo_b, cos=cos, sin=sin_signed, cos_r=cos_r, sin_r=sin_r,
                D=D, H=H, group=group, num_kv_heads=num_kv_heads)


def attention_forward(x, params):
    """x: (B, S, H) float32; params from prepare_attention_params (built once)."""
    B, S, H = x.shape
    D = params["D"]
    group = params["group"]
    nkv = params["num_kv_heads"]
    KV = nkv * D

    x_bf = x.astype(jnp.bfloat16)   # halve the per-step x HBM->VMEM DMA bytes

    kernel = make_attention_kernel(S, D, H, group, nkv)

    return pl.pallas_call(
        kernel,
        out_shape=jax.ShapeDtypeStruct((B, S, H), x.dtype),
        grid=(B,),
        in_specs=[
            pl.BlockSpec((1, S, H), lambda b: (b, 0, 0)),            # x (bf16), per batch
            pl.BlockSpec((S * group, D), lambda b: (0, 0)),          # cos_r   (resident)
            pl.BlockSpec((S * group, D), lambda b: (0, 0)),          # sin_r   (resident)
            pl.BlockSpec((S, D), lambda b: (0, 0)),                  # cos     (resident)
            pl.BlockSpec((S, D), lambda b: (0, 0)),                  # sin     (resident)
            pl.BlockSpec((H, H + 2 * KV), lambda b: (0, 0)),         # fused wqkv (resident)
            pl.BlockSpec((H, H), lambda b: (0, 0)),                  # wo      (resident)
        ],
        out_specs=pl.BlockSpec((1, S, H), lambda b: (b, 0, 0)),
        compiler_params=pltpu.CompilerParams(
            dimension_semantics=("parallel",),
        ),
    )(x_bf, params["cos_r"], params["sin_r"], params["cos"], params["sin"],
      params["wqkv"], params["wo"])


def ref_forward(x, cos, sin, wq_t, wk_t, wv_t, wo_t, nh, nkv):
    """Pure-JAX f32 reference mirroring the PyTorch forward."""
    B, S, H = x.shape
    D = H // nh
    q = x @ wq_t
    k = x @ wk_t
    v = x @ wv_t
    q = q.reshape(B, S, nh, D).transpose(0, 2, 1, 3)
    k = k.reshape(B, S, nkv, D).transpose(0, 2, 1, 3)
    v = v.reshape(B, S, nkv, D).transpose(0, 2, 1, 3)
    c = cos[None, None]
    s = sin[None, None]

    def rot(t):
        t1, t2 = jnp.split(t, 2, axis=-1)
        return jnp.concatenate([-t2, t1], axis=-1)

    q = q * c + rot(q) * s
    k = k * c + rot(k) * s
    rep = nh // nkv
    k = jnp.repeat(k, rep, axis=1)
    v = jnp.repeat(v, rep, axis=1)
    aw = (q @ jnp.swapaxes(k, -2, -1)) / math.sqrt(D)
    aw = jax.nn.softmax(aw, axis=-1)
    out = aw @ v
    out = out.transpose(0, 2, 1, 3).reshape(B, S, H)
    return out @ wo_t


if __name__ == "__main__":
    # Small config consistent with the module; head_dim=128 keeps all slabs
    # lane-aligned (multiples of 128) for the TPU kernel.
    B, S = 2, 16
    NH, NKV, D = 4, 2, 128
    H = NH * D            # 512
    KV = NKV * D          # 256

    key = jax.random.PRNGKey(0)
    kx, kq, kk, kv_, ko = jax.random.split(key, 5)

    x = jax.random.normal(kx, (B, S, H), dtype=jnp.float32)

    # Deterministic "Linear(bias=False)" weights, PyTorch-style (out, in), then
    # transposed to (in, out) for the kernel.
    wq = jax.random.normal(kq, (H, H), dtype=jnp.float32) * (1.0 / math.sqrt(H))
    wk = jax.random.normal(kk, (KV, H), dtype=jnp.float32) * (1.0 / math.sqrt(H))
    wv = jax.random.normal(kv_, (KV, H), dtype=jnp.float32) * (1.0 / math.sqrt(H))
    wo = jax.random.normal(ko, (H, H), dtype=jnp.float32) * (1.0 / math.sqrt(H))
    wq_t, wk_t, wv_t, wo_t = wq.T, wk.T, wv.T, wo.T

    # Standard RoPE cos/sin tables, shape (S, D).
    inv_freq = 1.0 / (10000.0 ** (jnp.arange(0, D, 2, dtype=jnp.float32) / D))
    t = jnp.arange(S, dtype=jnp.float32)
    freqs = jnp.einsum("s,d->sd", t, inv_freq)
    emb = jnp.concatenate([freqs, freqs], axis=-1)
    cos = jnp.cos(emb)
    sin = jnp.sin(emb)

    # One-time parameter prep (fused bf16 weights, sign-folded / replicated tables).
    params = prepare_attention_params(cos, sin, wq_t, wk_t, wv_t, wo_t, NH, NKV)
    params = jax.tree_util.tree_map(jax.block_until_ready, params)

    out = attention_forward(x, params)
    out = jax.block_until_ready(out)

    ref = ref_forward(x, cos, sin, wq_t, wk_t, wv_t, wo_t, NH, NKV)
    assert out.shape == (B, S, H)
    # bf16 MXU operands (f32 accumulation) + approx reciprocal => looser tolerance
    # than a pure-f32 check.
    assert jnp.allclose(out, ref, rtol=5e-2, atol=5e-2), \
        f"max abs err = {jnp.max(jnp.abs(out - ref))}"

    print("KERNEL_OK")
</pallas_src>

<mosaic_0001>
module attributes {stable_mosaic.version = 11 : i64} {
  func.func @kernel(%arg0: i32, %arg1: memref<1x16x512xbf16, #tpu.memory_space<vmem>>, %arg2: memref<32x128xf32, #tpu.memory_space<vmem>>, %arg3: memref<32x128xf32, #tpu.memory_space<vmem>>, %arg4: memref<16x128xf32, #tpu.memory_space<vmem>>, %arg5: memref<16x128xf32, #tpu.memory_space<vmem>>, %arg6: memref<512x1024xbf16, #tpu.memory_space<vmem>>, %arg7: memref<512x512xbf16, #tpu.memory_space<vmem>>, %arg8: memref<1x16x512xf32, #tpu.memory_space<vmem>>) attributes {dimension_semantics = [#tpu.dimension_semantics<parallel>], iteration_bounds = array<i64: 2>, scalar_prefetch = 0 : i64, scratch_operands = 0 : i64, tpu.core_type = #tpu.core_type<tc>, window_params = [{transform_indices = @transform_0, window_bounds = array<i64: 1, 16, 512>}, {pipeline_mode = #tpu.pipeline_mode<synchronous>, transform_indices = @transform_1, window_bounds = array<i64: 32, 128>}, {pipeline_mode = #tpu.pipeline_mode<synchronous>, transform_indices = @transform_2, window_bounds = array<i64: 32, 128>}, {pipeline_mode = #tpu.pipeline_mode<synchronous>, transform_indices = @transform_3, window_bounds = array<i64: 16, 128>}, {pipeline_mode = #tpu.pipeline_mode<synchronous>, transform_indices = @transform_4, window_bounds = array<i64: 16, 128>}, {pipeline_mode = #tpu.pipeline_mode<synchronous>, transform_indices = @transform_5, window_bounds = array<i64: 512, 1024>}, {pipeline_mode = #tpu.pipeline_mode<synchronous>, transform_indices = @transform_6, window_bounds = array<i64: 512, 512>}, {transform_indices = @transform_7, window_bounds = array<i64: 1, 16, 512>}]} {
    %c0 = arith.constant 0 : index
    %c0_0 = arith.constant 0 : index
    %c0_1 = arith.constant 0 : index
    %0 = vector.load %arg1[%c0, %c0_0, %c0_1] : memref<1x16x512xbf16, #tpu.memory_space<vmem>>, vector<1x16x512xbf16>
    %1 = vector.shape_cast %0 : vector<1x16x512xbf16> to vector<16x512xbf16>
    %c0_2 = arith.constant 0 : index
    %c0_3 = arith.constant 0 : index
    %2 = vector.load %arg6[%c0_2, %c0_3] : memref<512x1024xbf16, #tpu.memory_space<vmem>>, vector<512x1024xbf16>
    %cst = arith.constant dense<0.000000e+00> : vector<16x1024xf32>
    %3 = tpu.matmul %1, %2, %cst {dimension_numbers = #tpu.dot_dimension_numbers<[1], [0], [0], [1], [0, 0, 1, 1], [], []>} : vector<16x512xbf16>, vector<512x1024xbf16>, vector<16x1024xf32> -> vector<16x1024xf32>
    %c0_4 = arith.constant 0 : index
    %c0_5 = arith.constant 0 : index
    %4 = vector.load %arg2[%c0_4, %c0_5] : memref<32x128xf32, #tpu.memory_space<vmem>>, vector<32x128xf32>
    %c0_6 = arith.constant 0 : index
    %c0_7 = arith.constant 0 : index
    %5 = vector.load %arg3[%c0_6, %c0_7] : memref<32x128xf32, #tpu.memory_space<vmem>>, vector<32x128xf32>
    %c0_8 = arith.constant 0 : index
    %c0_9 = arith.constant 0 : index
    %6 = vector.load %arg4[%c0_8, %c0_9] : memref<16x128xf32, #tpu.memory_space<vmem>>, vector<16x128xf32>
    %c0_10 = arith.constant 0 : index
    %c0_11 = arith.constant 0 : index
    %7 = vector.load %arg5[%c0_10, %c0_11] : memref<16x128xf32, #tpu.memory_space<vmem>>, vector<16x128xf32>
    %8 = vector.extract_strided_slice %3 {offsets = [0, 0], sizes = [16, 256], strides = [1, 1]} : vector<16x1024xf32> to vector<16x256xf32>
    %9 = vector.shape_cast %8 : vector<16x256xf32> to vector<32x128xf32>
    %10 = arith.mulf %9, %4 : vector<32x128xf32>
    %c64_i32 = arith.constant 64 : i32
    %11 = tpu.dynamic_rotate %9 by %c64_i32 dim 1 : vector<32x128xf32>, i32 -> vector<32x128xf32>
    %12 = arith.mulf %11, %5 : vector<32x128xf32>
    %13 = arith.addf %10, %12 : vector<32x128xf32>
    %14 = vector.extract_strided_slice %3 {offsets = [0, 512], sizes = [16, 128], strides = [1, 1]} : vector<16x1024xf32> to vector<16x128xf32>
    %15 = arith.mulf %14, %6 : vector<16x128xf32>
    %c64_i32_12 = arith.constant 64 : i32
    %16 = tpu.dynamic_rotate %14 by %c64_i32_12 dim 1 : vector<16x128xf32>, i32 -> vector<16x128xf32>
    %17 = arith.mulf %16, %7 : vector<16x128xf32>
    %18 = arith.addf %15, %17 : vector<16x128xf32>
    %19 = vector.extract_strided_slice %3 {offsets = [0, 768], sizes = [16, 128], strides = [1, 1]} : vector<16x1024xf32> to vector<16x128xf32>
    %20 = arith.truncf %13 : vector<32x128xf32> to vector<32x128xbf16>
    %21 = arith.truncf %18 : vector<16x128xf32> to vector<16x128xbf16>
    %22 = arith.truncf %19 : vector<16x128xf32> to vector<16x128xbf16>
    %cst_13 = arith.constant dense<0.000000e+00> : vector<32x16xf32>
    %23 = tpu.matmul %20, %21, %cst_13 {dimension_numbers = #tpu.dot_dimension_numbers<[1], [1], [0], [0], [0, 0, 1, 0], [], []>} : vector<32x128xbf16>, vector<16x128xbf16>, vector<32x16xf32> -> vector<32x16xf32>
    %cst_14 = arith.constant dense<0xFF800000> : vector<32xf32>
    %24 = vector.multi_reduction <maximumf>, %23, %cst_14 [1] : vector<32x16xf32> to vector<32xf32>
    %25 = vector.shape_cast %24 : vector<32xf32> to vector<32x1xf32>
    %26 = vector.broadcast %25 : vector<32x1xf32> to vector<32x16xf32>
    %27 = arith.subf %23, %26 : vector<32x16xf32>
    %28 = math.exp %27 : vector<32x16xf32>
    %cst_15 = arith.constant dense<0.000000e+00> : vector<32xf32>
    %29 = vector.multi_reduction <add>, %28, %cst_15 [1] : vector<32x16xf32> to vector<32xf32>
    %30 = vector.shape_cast %29 : vector<32xf32> to vector<32x1xf32>
    %31 = arith.truncf %28 : vector<32x16xf32> to vector<32x16xbf16>
    %cst_16 = arith.constant dense<0.000000e+00> : vector<32x128xf32>
    %32 = tpu.matmul %31, %22, %cst_16 {dimension_numbers = #tpu.dot_dimension_numbers<[1], [0], [0], [1], [0, 0, 1, 1], [], []>} : vector<32x16xbf16>, vector<16x128xbf16>, vector<32x128xf32> -> vector<32x128xf32>
    %33 = tpu.reciprocal %30 {approx = true} : vector<32x1xf32> -> vector<32x1xf32>
    %34 = vector.broadcast %33 : vector<32x1xf32> to vector<32x128xf32>
    %35 = arith.mulf %32, %34 : vector<32x128xf32>
    %36 = vector.shape_cast %35 : vector<32x128xf32> to vector<16x256xf32>
    %37 = vector.extract_strided_slice %3 {offsets = [0, 256], sizes = [16, 256], strides = [1, 1]} : vector<16x1024xf32> to vector<16x256xf32>
    %38 = vector.shape_cast %37 : vector<16x256xf32> to vector<32x128xf32>
    %39 = arith.mulf %38, %4 : vector<32x128xf32>
    %c64_i32_17 = arith.constant 64 : i32
    %40 = tpu.dynamic_rotate %38 by %c64_i32_17 dim 1 : vector<32x128xf32>, i32 -> vector<32x128xf32>
    %41 = arith.mulf %40, %5 : vector<32x128xf32>
    %42 = arith.addf %39, %41 : vector<32x128xf32>
    %43 = vector.extract_strided_slice %3 {offsets = [0, 640], sizes = [16, 128], strides = [1, 1]} : vector<16x1024xf32> to vector<16x128xf32>
    %44 = arith.mulf %43, %6 : vector<16x128xf32>
    %c64_i32_18 = arith.constant 64 : i32
    %45 = tpu.dynamic_rotate %43 by %c64_i32_18 dim 1 : vector<16x128xf32>, i32 -> vector<16x128xf32>
    %46 = arith.mulf %45, %7 : vector<16x128xf32>
    %47 = arith.addf %44, %46 : vector<16x128xf32>
    %48 = vector.extract_strided_slice %3 {offsets = [0, 896], sizes = [16, 128], strides = [1, 1]} : vector<16x1024xf32> to vector<16x128xf32>
    %49 = arith.truncf %42 : vector<32x128xf32> to vector<32x128xbf16>
    %50 = arith.truncf %47 : vector<16x128xf32> to vector<16x128xbf16>
    %51 = arith.truncf %48 : vector<16x128xf32> to vector<16x128xbf16>
    %cst_19 = arith.constant dense<0.000000e+00> : vector<32x16xf32>
    %52 = tpu.matmul %49, %50, %cst_19 {dimension_numbers = #tpu.dot_dimension_numbers<[1], [1], [0], [0], [0, 0, 1, 0], [], []>} : vector<32x128xbf16>, vector<16x128xbf16>, vector<32x16xf32> -> vector<32x16xf32>
    %cst_20 = arith.constant dense<0xFF800000> : vector<32xf32>
    %53 = vector.multi_reduction <maximumf>, %52, %cst_20 [1] : vector<32x16xf32> to vector<32xf32>
    %54 = vector.shape_cast %53 : vector<32xf32> to vector<32x1xf32>
    %55 = vector.broadcast %54 : vector<32x1xf32> to vector<32x16xf32>
    %56 = arith.subf %52, %55 : vector<32x16xf32>
    %57 = math.exp %56 : vector<32x16xf32>
    %cst_21 = arith.constant dense<0.000000e+00> : vector<32xf32>
    %58 = vector.multi_reduction <add>, %57, %cst_21 [1] : vector<32x16xf32> to vector<32xf32>
    %59 = vector.shape_cast %58 : vector<32xf32> to vector<32x1xf32>
    %60 = arith.truncf %57 : vector<32x16xf32> to vector<32x16xbf16>
    %cst_22 = arith.constant dense<0.000000e+00> : vector<32x128xf32>
    %61 = tpu.matmul %60, %51, %cst_22 {dimension_numbers = #tpu.dot_dimension_numbers<[1], [0], [0], [1], [0, 0, 1, 1], [], []>} : vector<32x16xbf16>, vector<16x128xbf16>, vector<32x128xf32> -> vector<32x128xf32>
    %62 = tpu.reciprocal %59 {approx = true} : vector<32x1xf32> -> vector<32x1xf32>
    %63 = vector.broadcast %62 : vector<32x1xf32> to vector<32x128xf32>
    %64 = arith.mulf %61, %63 : vector<32x128xf32>
    %65 = vector.shape_cast %64 : vector<32x128xf32> to vector<16x256xf32>
    %66 = tpu.concatenate %36, %65 in 1 : vector<16x256xf32>, vector<16x256xf32> -> vector<16x512xf32>
    %67 = arith.truncf %66 : vector<16x512xf32> to vector<16x512xbf16>
    %c0_23 = arith.constant 0 : index
    %c0_24 = arith.constant 0 : index
    %68 = vector.load %arg7[%c0_23, %c0_24] : memref<512x512xbf16, #tpu.memory_space<vmem>>, vector<512x512xbf16>
    %cst_25 = arith.constant dense<0.000000e+00> : vector<16x512xf32>
    %69 = tpu.matmul %67, %68, %cst_25 {dimension_numbers = #tpu.dot_dimension_numbers<[1], [0], [0], [1], [0, 0, 1, 1], [], []>} : vector<16x512xbf16>, vector<512x512xbf16>, vector<16x512xf32> -> vector<16x512xf32>
    %c0_26 = arith.constant 0 : index
    %c0_27 = arith.constant 0 : index
    %c0_28 = arith.constant 0 : index
    %70 = vector.load %arg8[%c0_26, %c0_27, %c0_28] : memref<1x16x512xf32, #tpu.memory_space<vmem>>, vector<1x16x512xf32>
    %71 = vector.shape_cast %70 : vector<1x16x512xf32> to vector<16x512xf32>
    %72 = vector.shape_cast %69 : vector<16x512xf32> to vector<1x16x512xf32>
    tpu.vector_store %arg8[%c0_26, %c0_27, %c0_28], %72 {strides = array<i32>} : memref<1x16x512xf32, #tpu.memory_space<vmem>>, vector<1x16x512xf32>,
    return
  }
  func.func @transform_0(%arg0: i32) -> (i32, i32, i32) {
    %c0_i32 = arith.constant 0 : i32
    %c0_i32_0 = arith.constant 0 : i32
    %c0_i32_1 = arith.constant 0 : i32
    return %arg0, %c0_i32, %c0_i32_0 : i32, i32, i32
  }
  func.func @transform_1(%arg0: i32) -> (i32, i32) {
    %c0_i32 = arith.constant 0 : i32
    %c0_i32_0 = arith.constant 0 : i32
    %c0_i32_1 = arith.constant 0 : i32
    return %c0_i32, %c0_i32_0 : i32, i32
  }
  func.func @transform_2(%arg0: i32) -> (i32, i32) {
    %c0_i32 = arith.constant 0 : i32
    %c0_i32_0 = arith.constant 0 : i32
    %c0_i32_1 = arith.constant 0 : i32
    return %c0_i32, %c0_i32_0 : i32, i32
  }
  func.func @transform_3(%arg0: i32) -> (i32, i32) {
    %c0_i32 = arith.constant 0 : i32
    %c0_i32_0 = arith.constant 0 : i32
    %c0_i32_1 = arith.constant 0 : i32
    return %c0_i32, %c0_i32_0 : i32, i32
  }
  func.func @transform_4(%arg0: i32) -> (i32, i32) {
    %c0_i32 = arith.constant 0 : i32
    %c0_i32_0 = arith.constant 0 : i32
    %c0_i32_1 = arith.constant 0 : i32
    return %c0_i32, %c0_i32_0 : i32, i32
  }
  func.func @transform_5(%arg0: i32) -> (i32, i32) {
    %c0_i32 = arith.constant 0 : i32
    %c0_i32_0 = arith.constant 0 : i32
    %c0_i32_1 = arith.constant 0 : i32
    return %c0_i32, %c0_i32_0 : i32, i32
  }
  func.func @transform_6(%arg0: i32) -> (i32, i32) {
    %c0_i32 = arith.constant 0 : i32
    %c0_i32_0 = arith.constant 0 : i32
    %c0_i32_1 = arith.constant 0 : i32
    return %c0_i32, %c0_i32_0 : i32, i32
  }
  func.func @transform_7(%arg0: i32) -> (i32, i32, i32) {
    %c0_i32 = arith.constant 0 : i32
    %c0_i32_0 = arith.constant 0 : i32
    %c0_i32_1 = arith.constant 0 : i32
    return %arg0, %c0_i32, %c0_i32_0 : i32, i32, i32
  }
}

</mosaic_0001>

<bundles_post_ra>
// kernel: tpu_custom_call.1
= control target key start
LH: loop header
LB: loop body
LE: loop exit
PB: predicated region body
PF: predicated region fallthrough
CT: control target
= control target key end

     0   :  { %s5576_s0 = inlined_call_operand.hbm [shape: bf16[2,16,512], index: 0, kind: input, shape index: {}]   ;;  %s5577_s1 = inlined_call_operand.hbm [shape: f32[32,128], index: 1, kind: input, shape index: {}]   ;;  %s5578_s2 = inlined_call_operand.hbm [shape: f32[32,128], index: 2, kind: input, shape index: {}]   ;;  %s5579_s3 = inlined_call_operand.hbm [shape: f32[16,128], index: 3, kind: input, shape index: {}]   ;;  %s5580_s4 = inlined_call_operand.hbm [shape: f32[16,128], index: 4, kind: input, shape index: {}]   ;;  %s5581_s5 = inlined_call_operand.hbm [shape: bf16[512,1024], index: 5, kind: input, shape index: {}]   ;;  %s5582_s6 = inlined_call_operand.hbm [shape: bf16[512,512], index: 6, kind: input, shape index: {}]   ;;  %s5583_s7 = inlined_call_operand.hbm [shape: f32[2,16,512], index: 7, kind: output, shape index: {}]  }
   0x1   :  { %5591 = sst [smem:[#allocation20_spill]] %s5577_s1 }
   0x2   :  { %12 = vsyncpa [#allocation3], 0 }
   0x3   :  { %14 = vsyncpa [#allocation3 + $0x1], 0 }
   0x4   :  { %15 = vsyncpa [#allocation6], 0 }
   0x5   :  { %16 = vsyncpa [#allocation9], 0 }
   0x6   :  { %17 = vsyncpa [#allocation12], 0 }
   0x7   :  { %18 = vsyncpa [#allocation4], 0 }
   0x8   :  { %20 = vsyncpa [#allocation4 + $0x1], 0  ;;  %s5094_s24 = smov 0   ;;  %s5096_s25 = smov 0  }
   0x9   :  { %s5098_s26 = smov 0   ;;  %s5100_s27 = smov 0  }
   0xa LB: > { %s5035_s28 = smov [#allocation5]   ;;  %s5115_s30 = sadd.s32 4294967295, %s5033_s27   ;;  %s5033_s27 = sphi %s5100_s27, %s5617_s27   ;;  %s5029_s26 = sphi %s5098_s26, %s5616_s26   ;;  %s5025_s25 = sphi %s5096_s25, %s5615_s25   ;;  %s5021_s24 = sphi %s5094_s24, %s5614_s24  }
   0xb   : > { %s221_s29 = sshll.u32 %s5035_s28, 4  ;;  %p3927_p0 = scmp.ge.s32.totalorder %s5033_s27, 1  ;;  %s5120_s29 = int_to_ptr.vmem [resolvable:$true] %s221_s29 }
   0xc   : > { %p5588_p1 = scmp.eq.s32.totalorder %s5115_s30, 0  ;;  %p209_p2 = scmp.lt.s32.totalorder %s5033_s27, 3 }
   0xd   : > { %s5036_s9 = smov [#allocation8]   ;;  %s5037_s12 = smov [#allocation11]  }
   0xe   : > { %p5122_p3 = pnand %p3927_p0, %p209_p2  ;;  %s247_s10 = sshll.u32 %s5036_s9, 4  ;;  %s5135_s10 = int_to_ptr.vmem [resolvable:$true] %s247_s10 }
   0xf   : > { %s273_s13 = sshll.u32 %s5037_s12, 4  ;;  %s5594_s1 = sld [smem:[#allocation20_spill]]  ;;  %s5137_s13 = int_to_ptr.vmem [resolvable:$true] %s273_s13 }
  0x10   : > { %s5592_s8 = scalar_select %p5122_p3, 1, 0 }
  0x11   : > { %p4434_p5 = pneg %p5122_p3 }
  0x13   : > { %p5131_p6 = pnand %p4434_p5, %p5588_p1 }
  0x15   : > { %s4757_s16 = scalar_lea.hbm %s5594_s1, 512  ;;  %p5147_p8 = pneg %p5131_p6 }
  0x16   : > { %p4758_p7 = scmp.ne.s32.totalorder %s5594_s1, %s4757_s16  ;;  %p4764_p11 = scmp.lt.u32.totalorder %s4757_s16, %s5594_s1 }
  0x18   : > { %p4760_p9 = pnand %p5147_p8, %p4758_p7 }
  0x1a   : > { %p4761_p10 = pneg %p4760_p9 }
  0x1c   : > { %p4766_p12 = pnand %p4764_p11, %p4761_p10 }
  0x1e   : > { %4769 = shalt.err (!%p4766_p12)
}
  0x1f   : > { %s4770_s22 = scalar_lea.vmem %s5120_s29, 512  ;;  %p4778_p5 = scmp.lt.s32.totalorder %s5120_s29, %s5120_s29 }
  0x20   : > { %p4771_p13 = scmp.ne.s32.totalorder %s5120_s29, %s4770_s22  ;;  %p4779_p4 = scmp.lt.s32.totalorder %s4770_s22, %s4770_s22 }
  0x22   : > { %p4773_p0 = pnand %p4771_p13, %p5147_p8  ;;  %p4780_p7 = por %p4779_p4, %p4778_p5 }
  0x24   : > { %p4774_p2 = pneg %p4773_p0 }
  0x26   : > { %p4781_p9 = pnand %p4780_p7, %p4774_p2 }
  0x28   : > { %4784 = shalt.err (!%p4781_p9)
}
  0x29   : > { %s5584_s23 = smov 128   ;;  %s5586_s28 = smov 8  }
  0x2a   : > { %4437 = dma.hbm_to_vmem [thread:$0]  (!%p5131_p6), %s5594_s1, 512, %s5120_s29, [#allocation6], %s5584_s23, %s5584_s23, %s5586_s28  }
  0x2b   : > { %s4785_s16 = scalar_lea.hbm %s5579_s3, 256 }
  0x2c   : > { %p4786_p4 = scmp.ne.s32.totalorder %s5579_s3, %s4785_s16  ;;  %p4792_p12 = scmp.lt.u32.totalorder %s4785_s16, %s5579_s3 }
  0x2e   : > { %p4788_p10 = pnand %p4786_p4, %p5147_p8 }
  0x30   : > { %p4789_p11 = pneg %p4788_p10 }
  0x32   : > { %p4794_p13 = pnand %p4792_p12, %p4789_p11 }
  0x34   : > { %4797 = shalt.err (!%p4794_p13)
}
  0x35   : > { %s4798_s29 = scalar_lea.vmem %s5135_s10, 256  ;;  %p4806_p7 = scmp.lt.s32.totalorder %s5135_s10, %s5135_s10 }
  0x36   : > { %p4799_p0 = scmp.ne.s32.totalorder %s5135_s10, %s4798_s29  ;;  %p4807_p9 = scmp.lt.s32.totalorder %s4798_s29, %s4798_s29 }
  0x38   : > { %p4801_p2 = pnand %p4799_p0, %p5147_p8  ;;  %p4808_p4 = por %p4807_p9, %p4806_p7 }
  0x3a   : > { %p4802_p5 = pneg %p4801_p2 }
  0x3c   : > { %p4809_p10 = pnand %p4808_p4, %p4802_p5 }
  0x3e   : > { %4812 = shalt.err (!%p4809_p10)
}
  0x3f   : > { %4443 = dma.hbm_to_vmem [thread:$0]  (!%p5131_p6), %s5579_s3, 256, %s5135_s10, [#allocation9], %s5584_s23, %s5584_s23, %s5586_s28  }
  0x40   : > { %s4813_s15 = scalar_lea.hbm %s5581_s5, 32768 }
  0x41   : > { %p4814_p11 = scmp.ne.s32.totalorder %s5581_s5, %s4813_s15  ;;  %p4820_p0 = scmp.lt.u32.totalorder %s4813_s15, %s5581_s5 }
  0x43   : > { %p4816_p12 = pnand %p4814_p11, %p5147_p8 }
  0x45   : > { %p4817_p13 = pneg %p4816_p12 }
  0x47   : > { %p4822_p2 = pnand %p4820_p0, %p4817_p13 }
  0x49   : > { %4825 = shalt.err (!%p4822_p2)
}
  0x4a   : > { %s4826_s10 = scalar_lea.vmem %s5137_s13, 32768  ;;  %p4834_p4 = scmp.lt.s32.totalorder %s5137_s13, %s5137_s13 }
  0x4b   : > { %p4827_p5 = scmp.ne.s32.totalorder %s5137_s13, %s4826_s10  ;;  %p4835_p10 = scmp.lt.s32.totalorder %s4826_s10, %s4826_s10 }
  0x4d   : > { %p4829_p7 = pnand %p4827_p5, %p5147_p8  ;;  %p4836_p11 = por %p4835_p10, %p4834_p4 }
  0x4f   : > { %p4830_p9 = pneg %p4829_p7 }
  0x51   : > { %p4837_p12 = pnand %p4836_p11, %p4830_p9 }
  0x53   : > { %4840 = shalt.err (!%p4837_p12)
}
  0x54   : > { %s5040_s21 = smov 512   ;;  %s5041_s29 = smov 32  }
  0x55   : > { %4449 = dma.hbm_to_vmem [thread:$0]  (!%p5131_p6), %s5581_s5, 32768, %s5137_s13, [#allocation12], %s5040_s21, %s5040_s21, %s5041_s29  }
  0x56   : > { %s5042_s12 = smov [#allocation7]   ;;  %s5043_s15 = smov [#allocation10]  }
  0x57   : > { %s234_s14 = sshll.u32 %s5042_s12, 4  ;;  %s260_s16 = sshll.u32 %s5043_s15, 4  ;;  %s235_s14 = int_to_ptr.vmem [resolvable:$true] %s234_s14  ;;  %s261_s16 = int_to_ptr.vmem [resolvable:$true] %s260_s16 }
  0x58   : > { %s4841_s20 = scalar_lea.hbm %s5578_s2, 512 }
  0x59   : > { %p4842_p13 = scmp.ne.s32.totalorder %s5578_s2, %s4841_s20  ;;  %p4848_p5 = scmp.lt.u32.totalorder %s4841_s20, %s5578_s2 }
  0x5b   : > { %p4844_p0 = pnand %p4842_p13, %p5147_p8 }
  0x5d   : > { %p4845_p2 = pneg %p4844_p0 }
  0x5f   : > { %p4850_p7 = pnand %p4848_p5, %p4845_p2 }
  0x61   : > { %4853 = shalt.err (!%p4850_p7)
}
  0x62   : > { %s4854_s13 = scalar_lea.vmem %s235_s14, 512  ;;  %p4862_p11 = scmp.lt.s32.totalorder %s235_s14, %s235_s14 }
  0x63   : > { %p4855_p9 = scmp.ne.s32.totalorder %s235_s14, %s4854_s13  ;;  %p4863_p12 = scmp.lt.s32.totalorder %s4854_s13, %s4854_s13 }
  0x65   : > { %p4857_p4 = pnand %p4855_p9, %p5147_p8  ;;  %p4864_p1 = por %p4863_p12, %p4862_p11 }
  0x67   : > { %p4858_p10 = pneg %p4857_p4 }
  0x69   : > { %p4865_p3 = pnand %p4864_p1, %p4858_p10 }
  0x6b   : > { %4868 = shalt.err (!%p4865_p3)
}
  0x6c   : > { %s5596_s23 = smov 8   ;;  %s5597_s21 = smov 128  }
  0x6d   : > { %4440 = dma.hbm_to_vmem [thread:$0]  (!%p5131_p6), %s5578_s2, 512, %s235_s14, [#allocation6], %s5597_s21, %s5597_s21, %s5596_s23  }
  0x6e   : > { %s4869_s9 = scalar_lea.hbm %s5580_s4, 256 }
  0x6f   : > { %p4870_p1 = scmp.ne.s32.totalorder %s5580_s4, %s4869_s9  ;;  %p4876_p0 = scmp.lt.u32.totalorder %s4869_s9, %s5580_s4 }
  0x71   : > { %p4872_p3 = pnand %p4870_p1, %p5147_p8 }
  0x73   : > { %p4873_p13 = pneg %p4872_p3 }
  0x75   : > { %p4878_p2 = pnand %p4876_p0, %p4873_p13 }
  0x77   : > { %4881 = shalt.err (!%p4878_p2)
}
  0x78   : > { %s4882_s20 = scalar_lea.vmem %s261_s16, 256  ;;  %p4890_p4 = scmp.lt.s32.totalorder %s261_s16, %s261_s16 }
  0x79   : > { %p4883_p5 = scmp.ne.s32.totalorder %s261_s16, %s4882_s20  ;;  %p4891_p10 = scmp.lt.s32.totalorder %s4882_s20, %s4882_s20 }
  0x7b   : > { %p4885_p7 = pnand %p4883_p5, %p5147_p8  ;;  %p4892_p11 = por %p4891_p10, %p4890_p4 }
  0x7d   : > { %p4886_p9 = pneg %p4885_p7 }
  0x7f   : > { %p4893_p12 = pnand %p4892_p11, %p4886_p9 }
  0x81   : > { %4896 = shalt.err (!%p4893_p12)
}
  0x82   : > { %4446 = dma.hbm_to_vmem [thread:$0]  (!%p5131_p6), %s5580_s4, 256, %s261_s16, [#allocation9], %s5597_s21, %s5597_s21, %s5596_s23  }
  0x83   : > { %s5044_s13 = smov [#allocation13]   ;;  %s4897_s22 = scalar_lea.hbm %s5582_s6, 16384 }
  0x84   : > { %s286_s1 = sshll.u32 %s5044_s13, 4  ;;  %p4898_p1 = scmp.ne.s32.totalorder %s5582_s6, %s4897_s22  ;;  %s287_s1 = int_to_ptr.vmem [resolvable:$true] %s286_s1 }
  0x85   : > { %p4904_p0 = scmp.lt.u32.totalorder %s4897_s22, %s5582_s6 }
  0x86   : > { %p4900_p3 = pnand %p4898_p1, %p5147_p8 }
  0x88   : > { %p4901_p13 = pneg %p4900_p3 }
  0x8a   : > { %p4906_p2 = pnand %p4904_p0, %p4901_p13 }
  0x8c   : > { %4909 = shalt.err (!%p4906_p2)
}
  0x8d   : > { %s4910_s16 = scalar_lea.vmem %s287_s1, 16384  ;;  %p4918_p4 = scmp.lt.s32.totalorder %s287_s1, %s287_s1 }
  0x8e   : > { %p4911_p5 = scmp.ne.s32.totalorder %s287_s1, %s4910_s16  ;;  %p4919_p10 = scmp.lt.s32.totalorder %s4910_s16, %s4910_s16 }
  0x90   : > { %p4913_p7 = pnand %p4911_p5, %p5147_p8  ;;  %p4920_p11 = por %p4919_p10, %p4918_p4 }
  0x92   : > { %p4914_p9 = pneg %p4913_p7 }
  0x94   : > { %p4921_p12 = pnand %p4920_p11, %p4914_p9 }
  0x96   : > { %4924 = shalt.err (!%p4921_p12)
}
  0x97   : > { %s5045_s23 = smov 256   ;;  %s5046_s19 = smov 16  }
  0x98   : > { %4452 = dma.hbm_to_vmem [thread:$0]  (!%p5131_p6), %s5582_s6, 16384, %s287_s1, [#allocation12], %s5045_s23, %s5045_s23, %s5046_s19  }
  0x99   : > { %s3926_s20 = sadd.s32 4294967294, %s5033_s27   ;;  %s5285_s14 = sadd.s32 1, %s5033_s27  }
  0x9a   : > { %s30_s10 = ssub.s32 %s5033_s27, %s5285_s14  ;;  %s33_s13 = sadd.s32 1, %s5029_s26 }
  0x9b   : > { %p31_p8 = scmp.eq.s32.totalorder %s30_s10, 0  ;;  %p40_p1 = scmp.ne.s32.totalorder %s5029_s26, %s5025_s25 }
  0x9c   : > { %p41_p3 = scmp.eq.s32.totalorder %s5033_s27, 0  ;;  %p46_p13 = scmp.ne.s32.totalorder %s5025_s25, %s5021_s24 }
  0x9d   : > { %s5296_s11 = scalar_select %p31_p8, %s5029_s26, %s33_s13  }
  0x9e   : > { %p5298_p0 = por %p41_p3, %p40_p1  ;;  %p5599_p2 = scmp.eq.s32.totalorder %s5115_s30, 0 }
  0x9f   : > { %p196_p5 = scmp.eq.s32.totalorder %s5115_s30, 1  ;;  %p202_p7 = scmp.eq.s32.totalorder %s3926_s20, 1 }
  0xa0   : > { %p5304_p6 = por %p5599_p2, %p46_p13  ;;  %p4467_p9 = scmp.lt.s32.totalorder %s5033_s27, 2 }
  0xa1   : > { %s300_s29 = sand.u32 1, %s5029_s26   ;;  %p5311_p4 = por %p196_p5, %p40_p1 }
  0xa2   : > { %p5315_p10 = por %p202_p7, %p46_p13  ;;  %s3935_s12 = sshll.u32 %s300_s29, 5 }
  0xa3   : > { %s5601_s22 = scalar_select %p5311_p4, 1, 0 }
  0xa4   : > { %s5602_s9 = scalar_select %p5315_p10, 1, 0 }
  0xa5   : > { %s4344_s15 = sshll.u32 %s5033_s27, 9  ;;  %s304_s18 = scalar_lea.vmem [#allocation2], %s3935_s12 }
  0xa6   : > { %s5323_s21 = scalar_lea.hbm %s5576_s0, %s4344_s15  ;;  %s311_s20 = sshll.u32 %s304_s18, 4  ;;  %s5325_s20 = int_to_ptr.vmem [resolvable:$true] %s311_s20 }
  0xa7   : > { %p5329_p11 = pnand %p4467_p9, %p5298_p0  ;;  %s5333_s13 = scalar_lea.sflag [#allocation3], %s300_s29 }
  0xa8   : > { %s4925_s17 = scalar_lea.hbm %s5323_s21, 512  ;;  %s4930_s28 = scalar_lea.hbm %s5576_s0, 1024 }
  0xa9   : > { %p4926_p12 = scmp.ne.s32.totalorder %s5323_s21, %s4925_s17  ;;  %p4927_p8 = pneg %p5329_p11 }
  0xaa   : > { %p4931_p13 = scmp.lt.u32.totalorder %s5323_s21, %s5576_s0  ;;  %p4932_p0 = scmp.lt.u32.totalorder %s4930_s28, %s4925_s17 }
  0xab   : > { %p4928_p1 = pnand %p4927_p8, %p4926_p12  ;;  %p4934_p5 = scmp.lt.u32.totalorder %s4925_s17, %s5323_s21 }
  0xac   : > { %p4933_p2 = por %p4932_p0, %p4931_p13 }
  0xad   : > { %p4929_p3 = pneg %p4928_p1 }
  0xae   : > { %p4935_p7 = por %p4934_p5, %p4933_p2 }
  0xb0   : > { %p4936_p9 = pnand %p4935_p7, %p4929_p3 }
  0xb2   : > { %4939 = shalt.err (!%p4936_p9)
}
  0xb3   : > { %s4940_s29 = scalar_lea.vmem %s5325_s20, 512  ;;  %s5047_s12 = smov [#allocation2]  }
  0xb4   : > { %p4941_p12 = scmp.ne.s32.totalorder %s5325_s20, %s4940_s29  ;;  %s4945_s15 = sshll.u32 %s5047_s12, 4  ;;  %s4946_s15 = int_to_ptr.vmem [resolvable:$false] %s4945_s15 }
  0xb5   : > { %s4947_s16 = scalar_lea.vmem %s4946_s15, 1024  ;;  %p4948_p4 = scmp.lt.s32.totalorder %s5325_s20, %s4946_s15 }
  0xb6   : > { %p4943_p1 = pnand %p4941_p12, %p4927_p8  ;;  %p4949_p13 = scmp.lt.s32.totalorder %s4947_s16, %s4940_s29 }
  0xb8   : > { %p4944_p10 = pneg %p4943_p1  ;;  %p4950_p0 = por %p4949_p13, %p4948_p4 }
  0xba   : > { %p4951_p2 = pnand %p4950_p0, %p4944_p10 }
  0xbc   : > { %4954 = shalt.err (!%p4951_p2)
}
  0xbd   : > { %4456 = dma.hbm_to_vmem [thread:$0]  (!%p5329_p11), %s5323_s21, 512, %s5325_s20, %s5333_s13, %s5045_s23, %s5045_s23, %s5046_s19  }
  0xbe   : > { %p5604_p8 = scmp.ne.s32.totalorder %s5592_s8, 0 }
  0xbf   : > { %s5367_s17 = sand.u32 (!%p5604_p8), 1, %s5025_s25  }
  0xc0   : > { %323 = sbr.rel (%p5604_p8) target bundleno = 1714 (0x6b2), region = 48  ;;  %s3939_s28 = sshll.u32 (!%p5604_p8), %s5367_s17, 5 }
  0xc1   : > { %s326_s18 = scalar_lea.sflag (!%p5604_p8), [#allocation3], %s5367_s17  ;;  %s5371_s29 = scalar_lea.vmem (!%p5604_p8), [#allocation2], %s3939_s28 }
  0xc7   : > { %5000 = dma.done.wait (%p5304_p6), %s326_s18, 512  }
  0xc8   : > { %5002 = vsyncadd (%p5304_p6), %s326_s18, 4294966784  ;;  %p5605_p4 = scmp.eq.s32.totalorder %s5115_s30, 0 }
  0xca   : > { %5004 = dma.done.wait (%p5605_p4), [#allocation6], 1024   ;;  %p5606_p10 = pmov %p5605_p4 }
  0xcb   : > { %p5607_p11 = pmov %p5605_p4 }
  0xcc   : > { %5006 = vsyncadd (%p5606_p10), [#allocation6], 4294966272 }
  0xcd   : > { %5008 = dma.done.wait (%p5607_p11), [#allocation9], 512   ;;  %p5608_p3 = pmov %p5605_p4 }
  0xcf   : > { %5010 = vsyncadd (%p5608_p3), [#allocation9], 4294966784  ;;  %p5609_p5 = pmov %p5608_p3 }
  0xd0   : > { %p5610_p7 = pmov %p5608_p3 }
  0xd1   : > { %5012 = dma.done.wait (%p5609_p5), [#allocation12], 49152  }
  0xd2   : > { %5014 = vsyncadd (%p5610_p7), [#allocation12], 4294918144  ;;  %v389_v0 = vld [vmem:[#allocation11] sm:$0xff]  ;;  %v390_v31 = vld [vmem:[#allocation11 + $0x8] sm:$0xff]  ;;  %s5049_s8 = smov 64   ;;  %vm2424_vm0 = vcmask 130048  }
  0xd3   : > { %v393_v1 = vld [vmem:[#allocation11 + $0x20] sm:$0xff]  ;;  %v394_v34 = vld [vmem:[#allocation11 + $0x28] sm:$0xff]  ;;  %s3946_s23 = sshll.u32 %s5367_s17, 6  ;;  %s4345_s21 = sshll.u32 %s5115_s30, 10 }
  0xd4   : > { %v397_v2 = vld [vmem:[#allocation11 + $0x40] sm:$0xff]  ;;  %v3952_v3 = vcombine.high %v389_v0, %v393_v1  ;;  %v3951_v4 = vcombine.low %v389_v0, %v393_v1  ;;  %v3954_v36 = vcombine.high %v390_v31, %v394_v34  ;;  %v3953_v37 = vcombine.low %v390_v31, %v394_v34  ;;  %v398_v38 = vld [vmem:[#allocation11 + $0x48] sm:$0xff]  ;;  %s383_s19 = scalar_lea.vmem [#allocation14], %s3946_s23  ;;  %s5532_s13 = scalar_lea.hbm %s5583_s7, %s4345_s21 }
  0xd5   : > { %v401_v5 = vld [vmem:[#allocation11 + $0x60] sm:$0xff]  ;;  %v402_v39 = vld [vmem:[#allocation11 + $0x68] sm:$0xff]  ;;  %s3796_s1 = sshll.u32 %s383_s19, 4  ;;  %s3783_s30 = scalar_lea.sflag [#allocation4], %s5367_s17  ;;  %s5527_s1 = int_to_ptr.vmem [resolvable:$true] %s3796_s1 }
  0xd6   : > { %v3960_v6 = vcombine.high %v397_v2, %v401_v5  ;;  %v405_v7 = vld [vmem:[#allocation11 + $0x80] sm:$0xff]  ;;  %1945 = vmatprep.subr.bf16.mxu0 %v3952_v3  ;;  %v3959_v9 = vcombine.low %v397_v2, %v401_v5  ;;  %v3962_v40 = vcombine.high %v398_v38, %v402_v39  ;;  %v406_v41 = vld [vmem:[#allocation11 + $0x88] sm:$0xff]  ;;  %2031 = vmatprep.subr.bf16.mxu1 %v3954_v36  ;;  %s4955_s12 = scalar_lea.vmem %s5527_s1, 1024  ;;  %p5611_p9 = scmp.ne.s32.totalorder %s5601_s22, 0 }
  0xd7   : > { %v409_v8 = vld [vmem:[#allocation11 + $0xa0] sm:$0xff]  ;;  %1946 = vmatpush1.bf16.msra.mxu0 %v3951_v4  ;;  %v410_v42 = vld [vmem:[#allocation11 + $0xa8] sm:$0xff]  ;;  %2032 = vmatpush1.bf16.msra.mxu1 %v3953_v37  ;;  %v3961_v45 = vcombine.low %v398_v38, %v402_v39  ;;  %p4956_p6 = scmp.ne.s32.totalorder %s5527_s1, %s4955_s12  ;;  %s5051_s15 = smov [#allocation14]  }
  0xd8   : > { %1947 = vmatprep.subr.bf16.mxu0 %v3960_v6  ;;  %v3968_v10 = vcombine.high %v405_v7, %v409_v8  ;;  %v413_v11 = vld [vmem:[#allocation11 + $0xc0] sm:$0xff]  ;;  %v3967_v13 = vcombine.low %v405_v7, %v409_v8  ;;  %2033 = vmatprep.subr.bf16.mxu1 %v3962_v40  ;;  %v3970_v48 = vcombine.high %v406_v41, %v410_v42  ;;  %v414_v49 = vld [vmem:[#allocation11 + $0xc8] sm:$0xff]  ;;  %s4959_s16 = sshll.u32 %s5051_s15, 4  ;;  %s4960_s16 = int_to_ptr.vmem [resolvable:$false] %s4959_s16 }
  0xd9   : > { %v417_v12 = vld [vmem:[#allocation11 + $0xe0] sm:$0xff]  ;;  %v418_v50 = vld [vmem:[#allocation11 + $0xe8] sm:$0xff]  ;;  %v3969_v53 = vcombine.low %v406_v41, %v410_v42  ;;  %p4957_p12 = pnand %p4956_p6, %p5611_p9  ;;  %s4961_s28 = scalar_lea.vmem %s4960_s16, 2048 }
  0xda   : > { %v3976_v14 = vcombine.high %v413_v11, %v417_v12  ;;  %v421_v15 = vld [vmem:[#allocation11 + $0x100] sm:$0xff]  ;;  %v3975_v18 = vcombine.low %v413_v11, %v417_v12  ;;  %v3978_v56 = vcombine.high %v414_v49, %v418_v50  ;;  %v422_v57 = vld [vmem:[#allocation11 + $0x108] sm:$0xff]  ;;  %v3977_v63 = vcombine.low %v414_v49, %v418_v50  ;;  %p4962_p13 = scmp.lt.s32.totalorder %s5527_s1, %s4960_s16  ;;  %p4963_p0 = scmp.lt.s32.totalorder %s4961_s28, %s4955_s12 }
  0xdb   : > { %1948 = vmatpush1.bf16.msra.mxu0 %v3959_v9  ;;  %v425_v16 = vld [vmem:[#allocation11 + $0x120] sm:$0xff]  ;;  %2034 = vmatpush1.bf16.msra.mxu1 %v3961_v45  ;;  %v426_v58 = vld [vmem:[#allocation11 + $0x128] sm:$0xff]  ;;  %p4958_p1 = pneg %p4957_p12 }
  0xdc   : > { %1949 = vmatprep.subr.bf16.mxu0 %v3968_v10  ;;  %v5390_v17 = vld [vmem:[%s5371_s29 + $0x4] ss:$16 sps:$4 sm:$0xff]   ;;  %v3984_v19 = vcombine.high %v421_v15, %v425_v16  ;;  %v3983_v22 = vcombine.low %v421_v15, %v425_v16  ;;  %2035 = vmatprep.subr.bf16.mxu1 %v3970_v48  ;;  %v3986_v0 = vcombine.high %v422_v57, %v426_v58  ;;  %v430_v1 = vld [vmem:[#allocation11 + $0x148] sm:$0xff]  ;;  %v5395_v48 = vld [vmem:[%s5371_s29] ss:$16 sps:$4 sm:$0xff]   ;;  %p4964_p2 = por %p4963_p0, %p4962_p13 }
  0xdd   : > { %1977 = vmatprep.mubr.bf16.mxu0 %v5390_v17  ;;  %v429_v20 = vld [vmem:[#allocation11 + $0x140] sm:$0xff]  ;;  %2063 = vmatprep.mubr.bf16.mxu1 %v5390_v17  ;;  %v434_v2 = vld [vmem:[#allocation11 + $0x168] sm:$0xff]  ;;  %v3985_v7 = vcombine.low %v422_v57, %v426_v58 }
  0xde   : > { %v433_v21 = vld [vmem:[#allocation11 + $0x160] sm:$0xff]  ;;  %v3994_v8 = vcombine.high %v430_v1, %v434_v2  ;;  %v438_v9 = vld [vmem:[#allocation11 + $0x188] sm:$0xff]  ;;  %v3993_v15 = vcombine.low %v430_v1, %v434_v2  ;;  %p4965_p8 = pnand %p4964_p2, %p4958_p1 }
  0xdf   : > { %1950 = vmatpush1.bf16.msra.mxu0 %v3967_v13  ;;  %v3992_v23 = vcombine.high %v429_v20, %v433_v21  ;;  %v437_v24 = vld [vmem:[#allocation11 + $0x180] sm:$0xff]  ;;  %v3991_v26 = vcombine.low %v429_v20, %v433_v21  ;;  %2036 = vmatpush1.bf16.msra.mxu1 %v3969_v53  ;;  %v442_v10 = vld [vmem:[#allocation11 + $0x1a8] sm:$0xff] }
  0xe0   : > { %1951 = vmatprep.subr.bf16.mxu0 %v3976_v14  ;;  %v441_v25 = vld [vmem:[#allocation11 + $0x1a0] sm:$0xff]  ;;  %2037 = vmatprep.subr.bf16.mxu1 %v3978_v56  ;;  %v4002_v16 = vcombine.high %v438_v9, %v442_v10  ;;  %v462_v34 = vld [vmem:[#allocation11 + $0x248] sm:$0xff] }
  0xe1   : > { %v4000_v27 = vcombine.high %v437_v24, %v441_v25  ;;  %v445_v28 = vld [vmem:[#allocation11 + $0x1c0] sm:$0xff]  ;;  %v3999_v30 = vcombine.low %v437_v24, %v441_v25  ;;  %v4001_v24 = vcombine.low %v438_v9, %v442_v10  ;;  %v470_v42 = vld [vmem:[#allocation11 + $0x288] sm:$0xff] }
  0xe2   : > { %v449_v29 = vld [vmem:[#allocation11 + $0x1e0] sm:$0xff]  ;;  %v5398_v56 = vld [vmem:[%s5371_s29 + $0xc] ss:$16 sps:$4 sm:$0xff]  }
  0xe3   : > { %1952 = vmatpush1.bf16.msra.mxu0 %v3975_v18  ;;  %v4008_v32 = vcombine.high %v445_v28, %v449_v29  ;;  %v453_v33 = vld [vmem:[#allocation11 + $0x200] sm:$0xff]  ;;  %v4007_v43 = vcombine.low %v445_v28, %v449_v29  ;;  %2038 = vmatpush1.bf16.msra.mxu1 %v3977_v63  ;;  %v446_v18 = vld [vmem:[#allocation11 + $0x1c8] sm:$0xff] }
  0xe4   : > { %1953 = vmatprep.subr.bf16.mxu0 %v3984_v19  ;;  %v457_v35 = vld [vmem:[#allocation11 + $0x220] sm:$0xff]  ;;  %2039 = vmatprep.subr.bf16.mxu1 %v3986_v0  ;;  %v450_v19 = vld [vmem:[#allocation11 + $0x1e8] sm:$0xff] }
  0xe5   : > { %v4016_v44 = vcombine.high %v453_v33, %v457_v35  ;;  %v461_v46 = vld [vmem:[#allocation11 + $0x240] sm:$0xff]  ;;  %v4015_v51 = vcombine.low %v453_v33, %v457_v35  ;;  %v4010_v25 = vcombine.high %v446_v18, %v450_v19  ;;  %v466_v35 = vld [vmem:[#allocation11 + $0x268] sm:$0xff] }
  0xe6   : > { %v465_v47 = vld [vmem:[#allocation11 + $0x260] sm:$0xff]  ;;  %v4026_v41 = vcombine.high %v462_v34, %v466_v35  ;;  %v4025_v49 = vcombine.low %v462_v34, %v466_v35 }
  0xe7   : > { %1954 = vmatpush1.bf16.msra.mxu0 %v3983_v22  ;;  %v4024_v52 = vcombine.high %v461_v46, %v465_v47  ;;  %v469_v54 = vld [vmem:[#allocation11 + $0x280] sm:$0xff]  ;;  %v4023_v59 = vcombine.low %v461_v46, %v465_v47  ;;  %2040 = vmatpush1.bf16.msra.mxu1 %v3985_v7 }
  0xe8   : > { %1955 = vmatprep.subr.bf16.mxu0 %v3992_v23  ;;  %v473_v55 = vld [vmem:[#allocation11 + $0x2a0] sm:$0xff]  ;;  %2041 = vmatprep.subr.bf16.mxu1 %v3994_v8 }
  0xe9   : > { %v477_v60 = vld [vmem:[#allocation11 + $0x2c0] sm:$0xff]  ;;  %v4032_v62 = vcombine.high %v469_v54, %v473_v55  ;;  %v4031_v3 = vcombine.low %v469_v54, %v473_v55 }
  0xea   : > { %v481_v61 = vld [vmem:[#allocation11 + $0x2e0] sm:$0xff] }
  0xeb   : > { %1956 = vmatpush1.bf16.msra.mxu0 %v3991_v26  ;;  %v485_v4 = vld [vmem:[#allocation11 + $0x300] sm:$0xff]  ;;  %v4040_v6 = vcombine.high %v477_v60, %v481_v61  ;;  %v4039_v11 = vcombine.low %v477_v60, %v481_v61  ;;  %2042 = vmatpush1.bf16.msra.mxu1 %v3993_v15  ;;  %v454_v26 = vld [vmem:[#allocation11 + $0x208] sm:$0xff] }
  0xec   : > { %1957 = vmatprep.subr.bf16.mxu0 %v4000_v27  ;;  %v489_v5 = vld [vmem:[#allocation11 + $0x320] sm:$0xff]  ;;  %2043 = vmatprep.subr.bf16.mxu1 %v4002_v16  ;;  %v458_v27 = vld [vmem:[#allocation11 + $0x228] sm:$0xff] }
  0xed   : > { %v493_v12 = vld [vmem:[#allocation11 + $0x340] sm:$0xff]  ;;  %v4048_v14 = vcombine.high %v485_v4, %v489_v5  ;;  %v4047_v20 = vcombine.low %v485_v4, %v489_v5  ;;  %v4018_v33 = vcombine.high %v454_v26, %v458_v27  ;;  %v4017_v40 = vcombine.low %v454_v26, %v458_v27  ;;  %v486_v60 = vld [vmem:[#allocation11 + $0x308] sm:$0xff] }
  0xee   : > { %v497_v13 = vld [vmem:[#allocation11 + $0x360] sm:$0xff]  ;;  %v490_v61 = vld [vmem:[#allocation11 + $0x328] sm:$0xff] }
  0xef   : > { %1958 = vmatpush1.bf16.msra.mxu0 %v3999_v30  ;;  %v501_v21 = vld [vmem:[#allocation11 + $0x380] sm:$0xff]  ;;  %v4056_v23 = vcombine.high %v493_v12, %v497_v13  ;;  %v4055_v28 = vcombine.low %v493_v12, %v497_v13  ;;  %2044 = vmatpush1.bf16.msra.mxu1 %v4001_v24  ;;  %v494_v4 = vld [vmem:[#allocation11 + $0x348] sm:$0xff]  ;;  %v4049_v10 = vcombine.low %v486_v60, %v490_v61 }
  0xf0   : > { %1959 = vmatprep.subr.bf16.mxu0 %v4008_v32  ;;  %v505_v22 = vld [vmem:[#allocation11 + $0x3a0] sm:$0xff]  ;;  %v4009_v32 = vcombine.low %v446_v18, %v450_v19  ;;  %2045 = vmatprep.subr.bf16.mxu1 %v4010_v25  ;;  %v498_v5 = vld [vmem:[#allocation11 + $0x368] sm:$0xff] }
  0xf1   : > { %v509_v29 = vld [vmem:[#allocation11 + $0x3c0] sm:$0xff]  ;;  %v4064_v31 = vcombine.high %v501_v21, %v505_v22  ;;  %v4063_v36 = vcombine.low %v501_v21, %v505_v22  ;;  %v502_v12 = vld [vmem:[#allocation11 + $0x388] sm:$0xff]  ;;  %v4057_v19 = vcombine.low %v494_v4, %v498_v5 }
  0xf2   : > { %v513_v30 = vld [vmem:[#allocation11 + $0x3e0] sm:$0xff]  ;;  %v506_v13 = vld [vmem:[#allocation11 + $0x3a8] sm:$0xff] }
  0xf3   : > { %1960 = vmatpush1.bf16.msra.mxu0 %v4007_v43  ;;  %v517_v37 = vld [vmem:[#allocation11 + $0x400] sm:$0xff]  ;;  %v4072_v39 = vcombine.high %v509_v29, %v513_v30  ;;  %2046 = vmatpush1.bf16.msra.mxu1 %v4009_v32  ;;  %v474_v43 = vld [vmem:[#allocation11 + $0x2a8] sm:$0xff]  ;;  %v4065_v27 = vcombine.low %v502_v12, %v506_v13 }
  0xf4   : > { %1961 = vmatprep.subr.bf16.mxu0 %v4016_v44  ;;  %v521_v38 = vld [vmem:[#allocation11 + $0x420] sm:$0xff]  ;;  %2047 = vmatprep.subr.bf16.mxu1 %v4018_v33  ;;  %v4071_v44 = vcombine.low %v509_v29, %v513_v30  ;;  %v4034_v50 = vcombine.high %v470_v42, %v474_v43  ;;  %v4033_v58 = vcombine.low %v470_v42, %v474_v43  ;;  %v510_v21 = vld [vmem:[#allocation11 + $0x3c8] sm:$0xff] }
  0xf5   : > { %v525_v45 = vld [vmem:[#allocation11 + $0x440] sm:$0xff]  ;;  %v4080_v47 = vcombine.high %v517_v37, %v521_v38  ;;  %v4079_v53 = vcombine.low %v517_v37, %v521_v38  ;;  %v514_v22 = vld [vmem:[#allocation11 + $0x3e8] sm:$0xff] }
  0xf6   : > { %v529_v46 = vld [vmem:[#allocation11 + $0x460] sm:$0xff]  ;;  %v518_v29 = vld [vmem:[#allocation11 + $0x408] sm:$0xff]  ;;  %v4073_v35 = vcombine.low %v510_v21, %v514_v22 }
  0xf7   : > { %1962 = vmatpush1.bf16.msra.mxu0 %v4015_v51  ;;  %2048 = vmatpush1.bf16.msra.mxu1 %v4017_v40  ;;  %v478_v51 = vld [vmem:[#allocation11 + $0x2c8] sm:$0xff]  ;;  %v533_v54 = vld [vmem:[#allocation11 + $0x480] sm:$0xff]  ;;  %v4088_v57 = vcombine.high %v525_v45, %v529_v46 }
  0xf8   : > { %1963 = vmatprep.subr.bf16.mxu0 %v4024_v52  ;;  %2049 = vmatprep.subr.bf16.mxu1 %v4026_v41  ;;  %v482_v52 = vld [vmem:[#allocation11 + $0x2e8] sm:$0xff]  ;;  %v537_v55 = vld [vmem:[#allocation11 + $0x4a0] sm:$0xff] }
  0xf9   : > { %v541_v63 = vld [vmem:[#allocation11 + $0x4c0] sm:$0xff]  ;;  %v4096_v1 = vcombine.high %v533_v54, %v537_v55  ;;  %v4041_v2 = vcombine.low %v478_v51, %v482_v52  ;;  %v522_v30 = vld [vmem:[#allocation11 + $0x428] sm:$0xff] }
  0xfa   : > { %v545_v0 = vld [vmem:[#allocation11 + $0x4e0] sm:$0xff]  ;;  %v526_v37 = vld [vmem:[#allocation11 + $0x448] sm:$0xff]  ;;  %v4081_v43 = vcombine.low %v518_v29, %v522_v30 }
  0xfb   : > { %1964 = vmatpush1.bf16.msra.mxu0 %v4023_v59  ;;  %2050 = vmatpush1.bf16.msra.mxu1 %v4025_v49  ;;  %v4042_v59 = vcombine.high %v478_v51, %v482_v52  ;;  %v549_v7 = vld [vmem:[#allocation11 + $0x500] sm:$0xff]  ;;  %v4104_v9 = vcombine.high %v541_v63, %v545_v0  ;;  %v530_v38 = vld [vmem:[#allocation11 + $0x468] sm:$0xff] }
  0xfc   : > { %1965 = vmatprep.subr.bf16.mxu0 %v4032_v62  ;;  %2051 = vmatprep.subr.bf16.mxu1 %v4034_v50  ;;  %v4087_v62 = vcombine.low %v525_v45, %v529_v46  ;;  %v553_v8 = vld [vmem:[#allocation11 + $0x520] sm:$0xff]  ;;  %v534_v45 = vld [vmem:[#allocation11 + $0x488] sm:$0xff]  ;;  %v4089_v52 = vcombine.low %v526_v37, %v530_v38 }
  0xfd   : > { %v557_v15 = vld [vmem:[#allocation11 + $0x540] sm:$0xff]  ;;  %v4112_v18 = vcombine.high %v549_v7, %v553_v8  ;;  %v538_v46 = vld [vmem:[#allocation11 + $0x4a8] sm:$0xff] }
  0xfe   : > { %v561_v16 = vld [vmem:[#allocation11 + $0x560] sm:$0xff] }
  0xff   : > { %1966 = vmatpush1.bf16.msra.mxu0 %v4031_v3  ;;  %2052 = vmatpush1.bf16.msra.mxu1 %v4033_v58  ;;  %v4050_v3 = vcombine.high %v486_v60, %v490_v61  ;;  %v565_v24 = vld [vmem:[#allocation11 + $0x580] sm:$0xff]  ;;  %v4120_v26 = vcombine.high %v557_v15, %v561_v16  ;;  %v4097_v61 = vcombine.low %v534_v45, %v538_v46 }
 0x100   : > { %1967 = vmatprep.subr.bf16.mxu0 %v4040_v6  ;;  %2053 = vmatprep.subr.bf16.mxu1 %v4042_v59  ;;  %v4095_v6 = vcombine.low %v533_v54, %v537_v55  ;;  %v569_v25 = vld [vmem:[#allocation11 + $0x5a0] sm:$0xff]  ;;  %v542_v54 = vld [vmem:[#allocation11 + $0x4c8] sm:$0xff] }
 0x101   : > { %v573_v32 = vld [vmem:[#allocation11 + $0x5c0] sm:$0xff]  ;;  %v4128_v34 = vcombine.high %v565_v24, %v569_v25  ;;  %v546_v55 = vld [vmem:[#allocation11 + $0x4e8] sm:$0xff] }
 0x102   : > { %v577_v33 = vld [vmem:[#allocation11 + $0x5e0] sm:$0xff] }
 0x103   : > { %1968 = vmatpush1.bf16.msra.mxu0 %v4039_v11  ;;  %2054 = vmatpush1.bf16.msra.mxu1 %v4041_v2  ;;  %v4058_v11 = vcombine.high %v494_v4, %v498_v5  ;;  %v581_v40 = vld [vmem:[#allocation11 + $0x600] sm:$0xff]  ;;  %v4136_v42 = vcombine.high %v573_v32, %v577_v33 }
 0x104   : > { %1969 = vmatprep.subr.bf16.mxu0 %v4048_v14  ;;  %2055 = vmatprep.subr.bf16.mxu1 %v4050_v3  ;;  %v4103_v14 = vcombine.low %v541_v63, %v545_v0  ;;  %v585_v41 = vld [vmem:[#allocation11 + $0x620] sm:$0xff]  ;;  %v550_v63 = vld [vmem:[#allocation11 + $0x508] sm:$0xff]  ;;  %v4105_v3 = vcombine.low %v542_v54, %v546_v55 }
 0x105   : > { %v589_v49 = vld [vmem:[#allocation11 + $0x640] sm:$0xff]  ;;  %v4144_v51 = vcombine.high %v581_v40, %v585_v41  ;;  %v554_v0 = vld [vmem:[#allocation11 + $0x528] sm:$0xff] }
 0x106   : > { %v593_v50 = vld [vmem:[#allocation11 + $0x660] sm:$0xff] }
 0x107   : > { %1970 = vmatpush1.bf16.msra.mxu0 %v4047_v20  ;;  %2056 = vmatpush1.bf16.msra.mxu1 %v4049_v10  ;;  %v4066_v20 = vcombine.high %v502_v12, %v506_v13  ;;  %v597_v58 = vld [vmem:[#allocation11 + $0x680] sm:$0xff]  ;;  %v4152_v60 = vcombine.high %v589_v49, %v593_v50 }
 0x108   : > { %1971 = vmatprep.subr.bf16.mxu0 %v4056_v23  ;;  %2057 = vmatprep.subr.bf16.mxu1 %v4058_v11  ;;  %v4111_v23 = vcombine.low %v549_v7, %v553_v8  ;;  %v601_v59 = vld [vmem:[#allocation11 + $0x6a0] sm:$0xff]  ;;  %v558_v7 = vld [vmem:[#allocation11 + $0x548] sm:$0xff]  ;;  %v4113_v11 = vcombine.low %v550_v63, %v554_v0 }
 0x109   : > { %v4160_v2 = vcombine.high %v597_v58, %v601_v59  ;;  %v605_v4 = vld [vmem:[#allocation11 + $0x6c0] sm:$0xff]  ;;  %v562_v8 = vld [vmem:[#allocation11 + $0x568] sm:$0xff] }
 0x10a   : > { %v609_v5 = vld [vmem:[#allocation11 + $0x6e0] sm:$0xff] }
 0x10b   : > { %1972 = vmatpush1.bf16.msra.mxu0 %v4055_v28  ;;  %2058 = vmatpush1.bf16.msra.mxu1 %v4057_v19  ;;  %v4074_v28 = vcombine.high %v510_v21, %v514_v22  ;;  %v4168_v10 = vcombine.high %v605_v4, %v609_v5  ;;  %v613_v12 = vld [vmem:[#allocation11 + $0x700] sm:$0xff] }
 0x10c   : > { %1973 = vmatprep.subr.bf16.mxu0 %v4064_v31  ;;  %2059 = vmatprep.subr.bf16.mxu1 %v4066_v20  ;;  %v4119_v31 = vcombine.low %v557_v15, %v561_v16  ;;  %v617_v13 = vld [vmem:[#allocation11 + $0x720] sm:$0xff]  ;;  %v566_v15 = vld [vmem:[#allocation11 + $0x588] sm:$0xff]  ;;  %v4121_v20 = vcombine.low %v558_v7, %v562_v8 }
 0x10d   : > { %v570_v16 = vld [vmem:[#allocation11 + $0x5a8] sm:$0xff]  ;;  %v4176_v19 = vcombine.high %v613_v12, %v617_v13  ;;  %v621_v21 = vld [vmem:[#allocation11 + $0x740] sm:$0xff] }
 0x10e   : > { %v625_v22 = vld [vmem:[#allocation11 + $0x760] sm:$0xff] }
 0x10f   : > { %1974 = vmatpush1.bf16.msra.mxu0 %v4063_v36  ;;  %2060 = vmatpush1.bf16.msra.mxu1 %v4065_v27  ;;  %v4082_v36 = vcombine.high %v518_v29, %v522_v30  ;;  %v4184_v27 = vcombine.high %v621_v21, %v625_v22  ;;  %v629_v29 = vld [vmem:[#allocation11 + $0x780] sm:$0xff] }
 0x110   : > { %1975 = vmatprep.subr.bf16.mxu0 %v4072_v39  ;;  %2061 = vmatprep.subr.bf16.mxu1 %v4074_v28  ;;  %v4127_v39 = vcombine.low %v565_v24, %v569_v25  ;;  %v574_v24 = vld [vmem:[#allocation11 + $0x5c8] sm:$0xff]  ;;  %v4129_v28 = vcombine.low %v566_v15, %v570_v16  ;;  %v633_v30 = vld [vmem:[#allocation11 + $0x7a0] sm:$0xff] }
 0x111   : > { %v578_v25 = vld [vmem:[#allocation11 + $0x5e8] sm:$0xff] }
 0x113   : > { %1976 = vmatpush1.bf16.msra.mxu0 %v4071_v44  ;;  %2062 = vmatpush1.bf16.msra.mxu1 %v4073_v35  ;;  %v4090_v44 = vcombine.high %v526_v37, %v530_v38  ;;  %v4192_v35 = vcombine.high %v629_v29, %v633_v30  ;;  %v637_v37 = vld [vmem:[#allocation11 + $0x7c0] sm:$0xff] }
 0x114   : > { %1988 = vmatprep.subr.bf16.mxu0 %v4080_v47  ;;  %2074 = vmatprep.subr.bf16.mxu1 %v4082_v36  ;;  %v4135_v47 = vcombine.low %v573_v32, %v577_v33  ;;  %v582_v32 = vld [vmem:[#allocation11 + $0x608] sm:$0xff]  ;;  %v4137_v36 = vcombine.low %v574_v24, %v578_v25  ;;  %v641_v38 = vld [vmem:[#allocation11 + $0x7e0] sm:$0xff] }
 0x115   : > { %v586_v33 = vld [vmem:[#allocation11 + $0x628] sm:$0xff] }
 0x116   : > { %1978 = vmatmul.mubr.bf16.vlgmr.msra.gmra.mrb[0].mxu0 %v5395_v48  ;;  %2064 = vmatmul.mubr.bf16.vlgmr.msra.gmra.mrb[0].mxu1 %v5395_v48 }
 0x117   : > { %1989 = vmatpush1.bf16.msra.mxu0 %v4079_v53  ;;  %2020 = vmatprep.mubr.bf16.mxu0 %v5398_v56  ;;  %v4098_v53 = vcombine.high %v534_v45, %v538_v46  ;;  %v391_v45 = vld [vmem:[#allocation11 + $0x10] sm:$0xff] }
 0x118   : > { %1990 = vmatprep.subr.bf16.mxu0 %v4088_v57  ;;  %2075 = vmatpush1.bf16.msra.mxu1 %v4081_v43  ;;  %v4143_v57 = vcombine.low %v581_v40, %v585_v41  ;;  %v590_v40 = vld [vmem:[#allocation11 + $0x648] sm:$0xff]  ;;  %v4200_v43 = vcombine.high %v637_v37, %v641_v38  ;;  %v395_v46 = vld [vmem:[#allocation11 + $0x30] sm:$0xff] }
 0x119   : > { %2076 = vmatprep.subr.bf16.mxu1 %v4090_v44  ;;  %2106 = vmatprep.mubr.bf16.mxu1 %v5398_v56  ;;  %v594_v41 = vld [vmem:[#allocation11 + $0x668] sm:$0xff]  ;;  %v4145_v44 = vcombine.low %v582_v32, %v586_v33 }
 0x11b   : > { %1991 = vmatpush1.bf16.msra.mxu0 %v4087_v62  ;;  %v4106_v62 = vcombine.high %v542_v54, %v546_v55  ;;  %v399_v54 = vld [vmem:[#allocation11 + $0x50] sm:$0xff] }
 0x11c   : > { %1992 = vmatprep.subr.bf16.mxu0 %v4096_v1  ;;  %2077 = vmatpush1.bf16.msra.mxu1 %v4089_v52  ;;  %v4151_v1 = vcombine.low %v589_v49, %v593_v50  ;;  %v598_v49 = vld [vmem:[#allocation11 + $0x688] sm:$0xff]  ;;  %v3956_v52 = vcombine.high %v391_v45, %v395_v46  ;;  %v403_v55 = vld [vmem:[#allocation11 + $0x70] sm:$0xff] }
 0x11d   : > { %2078 = vmatprep.subr.bf16.mxu1 %v4098_v53  ;;  %v602_v50 = vld [vmem:[#allocation11 + $0x6a8] sm:$0xff]  ;;  %v4153_v53 = vcombine.low %v590_v40, %v594_v41 }
 0x11f   : > { %1993 = vmatpush1.bf16.msra.mxu0 %v4095_v6  ;;  %v4114_v6 = vcombine.high %v550_v63, %v554_v0  ;;  %v4161_v63 = vcombine.low %v598_v49, %v602_v50  ;;  %v407_v0 = vld [vmem:[#allocation11 + $0x90] sm:$0xff] }
 0x120   : > { %1994 = vmatprep.subr.bf16.mxu0 %v4104_v9  ;;  %2079 = vmatpush1.bf16.msra.mxu1 %v4097_v61  ;;  %v4159_v9 = vcombine.low %v597_v58, %v601_v59  ;;  %v5405_v58 = vld [vmem:[%s5371_s29 + $0x8] ss:$16 sps:$4 sm:$0xff]   ;;  %v3955_v61 = vcombine.low %v391_v45, %v395_v46  ;;  %v4754_v46 = vld [vmem:[%s5371_s29 + $0x4] ss:$16 sps:$4 sm:$0xff]  }
 0x121   : > { %2080 = vmatprep.subr.bf16.mxu1 %v4106_v62  ;;  %v606_v59 = vld [vmem:[#allocation11 + $0x6c8] sm:$0xff]  ;;  %v3964_v62 = vcombine.high %v399_v54, %v403_v55 }
 0x123   : > { %1995 = vmatpush1.bf16.msra.mxu0 %v4103_v14  ;;  %v4122_v14 = vcombine.high %v558_v7, %v562_v8  ;;  %v415_v8 = vld [vmem:[#allocation11 + $0xd0] sm:$0xff] }
 0x124   : > { %1996 = vmatprep.subr.bf16.mxu0 %v4112_v18  ;;  %2081 = vmatpush1.bf16.msra.mxu1 %v4105_v3  ;;  %v4167_v18 = vcombine.low %v605_v4, %v609_v5  ;;  %v614_v3 = vld [vmem:[#allocation11 + $0x708] sm:$0xff]  ;;  %v3963_v5 = vcombine.low %v399_v54, %v403_v55 }
 0x125   : > { %2082 = vmatprep.subr.bf16.mxu1 %v4114_v6  ;;  %v618_v4 = vld [vmem:[#allocation11 + $0x728] sm:$0xff] }
 0x127   : > { %1997 = vmatpush1.bf16.msra.mxu0 %v4111_v23  ;;  %v4130_v23 = vcombine.high %v566_v15, %v570_v16  ;;  %v4177_v15 = vcombine.low %v614_v3, %v618_v4  ;;  %v423_v16 = vld [vmem:[#allocation11 + $0x110] sm:$0xff] }
 0x128   : > { %1998 = vmatprep.subr.bf16.mxu0 %v4120_v26  ;;  %2083 = vmatpush1.bf16.msra.mxu1 %v4113_v11  ;;  %v4175_v26 = vcombine.low %v613_v12, %v617_v13  ;;  %v622_v11 = vld [vmem:[#allocation11 + $0x748] sm:$0xff] }
 0x129   : > { %2084 = vmatprep.subr.bf16.mxu1 %v4122_v14  ;;  %v626_v12 = vld [vmem:[#allocation11 + $0x768] sm:$0xff] }
 0x12b   : > { %1999 = vmatpush1.bf16.msra.mxu0 %v4119_v31  ;;  %v4138_v31 = vcombine.high %v574_v24, %v578_v25  ;;  %v431_v24 = vld [vmem:[#allocation11 + $0x150] sm:$0xff] }
 0x12c   : > { %2000 = vmatprep.subr.bf16.mxu0 %v4128_v34  ;;  %2085 = vmatpush1.bf16.msra.mxu1 %v4121_v20  ;;  %v4183_v34 = vcombine.low %v621_v21, %v625_v22  ;;  %v634_v20 = vld [vmem:[#allocation11 + $0x7a8] sm:$0xff]  ;;  %v435_v25 = vld [vmem:[#allocation11 + $0x170] sm:$0xff] }
 0x12d   : > { %2086 = vmatprep.subr.bf16.mxu1 %v4130_v23  ;;  %v4185_v23 = vcombine.low %v622_v11, %v626_v12 }
 0x12f   : > { %2001 = vmatpush1.bf16.msra.mxu0 %v4127_v39  ;;  %v4146_v39 = vcombine.high %v582_v32, %v586_v33  ;;  %v439_v32 = vld [vmem:[#allocation11 + $0x190] sm:$0xff] }
 0x130   : > { %2002 = vmatprep.subr.bf16.mxu0 %v4136_v42  ;;  %2087 = vmatpush1.bf16.msra.mxu1 %v4129_v28  ;;  %v4191_v42 = vcombine.low %v629_v29, %v633_v30  ;;  %v642_v28 = vld [vmem:[#allocation11 + $0x7e8] sm:$0xff]  ;;  %v3996_v30 = vcombine.high %v431_v24, %v435_v25  ;;  %v443_v33 = vld [vmem:[#allocation11 + $0x1b0] sm:$0xff] }
 0x131   : > { %2088 = vmatprep.subr.bf16.mxu1 %v4138_v31 }
 0x133   : > { %2003 = vmatpush1.bf16.msra.mxu0 %v4135_v47  ;;  %v4154_v47 = vcombine.high %v590_v40, %v594_v41  ;;  %v4003_v40 = vcombine.low %v439_v32, %v443_v33 }
 0x134   : > { %2004 = vmatprep.subr.bf16.mxu0 %v4144_v51  ;;  %2089 = vmatpush1.bf16.msra.mxu1 %v4137_v36  ;;  %v4199_v51 = vcombine.low %v637_v37, %v641_v38  ;;  %v4004_v36 = vcombine.high %v439_v32, %v443_v33  ;;  %v447_v38 = vld [vmem:[#allocation11 + $0x1d0] sm:$0xff] }
 0x135   : > { %2090 = vmatprep.subr.bf16.mxu1 %v4146_v39  ;;  %v451_v39 = vld [vmem:[#allocation11 + $0x1f0] sm:$0xff] }
 0x136   : > { %v4012_v41 = vcombine.high %v447_v38, %v451_v39 }
 0x137   : > { %2005 = vmatpush1.bf16.msra.mxu0 %v4143_v57  ;;  %v4162_v57 = vcombine.high %v598_v49, %v602_v50  ;;  %v467_v49 = vld [vmem:[#allocation11 + $0x270] sm:$0xff] }
 0x138   : > { %2006 = vmatprep.subr.bf16.mxu0 %v4152_v60  ;;  %2091 = vmatpush1.bf16.msra.mxu1 %v4145_v44  ;;  %v610_v60 = vld [vmem:[#allocation11 + $0x6e8] sm:$0xff]  ;;  %v4011_v44 = vcombine.low %v447_v38, %v451_v39 }
 0x139   : > { %2092 = vmatprep.subr.bf16.mxu1 %v4154_v47  ;;  %v4169_v7 = vcombine.low %v606_v59, %v610_v60  ;;  %v463_v47 = vld [vmem:[#allocation11 + $0x250] sm:$0xff] }
 0x13a   : > { %v4027_v54 = vcombine.low %v463_v47, %v467_v49 }
 0x13b   : > { %2007 = vmatpush1.bf16.msra.mxu0 %v4151_v1  ;;  %v411_v1 = vld [vmem:[#allocation11 + $0xb0] sm:$0xff] }
 0x13c   : > { %2008 = vmatprep.subr.bf16.mxu0 %v4160_v2  ;;  %2093 = vmatpush1.bf16.msra.mxu1 %v4153_v53  ;;  %v4170_v2 = vcombine.high %v606_v59, %v610_v60  ;;  %v3972_v6 = vcombine.high %v407_v0, %v411_v1  ;;  %v3971_v13 = vcombine.low %v407_v0, %v411_v1  ;;  %v475_v53 = vld [vmem:[#allocation11 + $0x2b0] sm:$0xff] }
 0x13d   : > { %2094 = vmatprep.subr.bf16.mxu1 %v4162_v57  ;;  %v479_v57 = vld [vmem:[#allocation11 + $0x2d0] sm:$0xff] }
 0x13e   : > { %v483_v59 = vld [vmem:[#allocation11 + $0x2f0] sm:$0xff] }
 0x13f   : > { %2009 = vmatpush1.bf16.msra.mxu0 %v4159_v9  ;;  %v419_v9 = vld [vmem:[#allocation11 + $0xf0] sm:$0xff]  ;;  %v4043_v0 = vcombine.low %v479_v57, %v483_v59 }
 0x140   : > { %2010 = vmatprep.subr.bf16.mxu0 %v4168_v10  ;;  %2095 = vmatpush1.bf16.msra.mxu1 %v4161_v63  ;;  %v4178_v10 = vcombine.high %v614_v3, %v618_v4  ;;  %v3980_v14 = vcombine.high %v415_v8, %v419_v9  ;;  %v3979_v21 = vcombine.low %v415_v8, %v419_v9  ;;  %v491_v63 = vld [vmem:[#allocation11 + $0x330] sm:$0xff] }
 0x141   : > { %2096 = vmatprep.subr.bf16.mxu1 %v4170_v2  ;;  %v495_v2 = vld [vmem:[#allocation11 + $0x350] sm:$0xff] }
 0x142   : > { %v499_v3 = vld [vmem:[#allocation11 + $0x370] sm:$0xff] }
 0x143   : > { %2011 = vmatpush1.bf16.msra.mxu0 %v4167_v18  ;;  %v427_v18 = vld [vmem:[#allocation11 + $0x130] sm:$0xff]  ;;  %v4059_v8 = vcombine.low %v495_v2, %v499_v3 }
 0x144   : > { %2012 = vmatprep.subr.bf16.mxu0 %v4176_v19  ;;  %2097 = vmatpush1.bf16.msra.mxu1 %v4169_v7  ;;  %v630_v19 = vld [vmem:[#allocation11 + $0x788] sm:$0xff]  ;;  %v3988_v22 = vcombine.high %v423_v16, %v427_v18  ;;  %v3987_v29 = vcombine.low %v423_v16, %v427_v18  ;;  %v507_v7 = vld [vmem:[#allocation11 + $0x3b0] sm:$0xff] }
 0x145   : > { %2098 = vmatprep.subr.bf16.mxu1 %v4178_v10  ;;  %v4193_v31 = vcombine.low %v630_v19, %v634_v20  ;;  %v511_v10 = vld [vmem:[#allocation11 + $0x3d0] sm:$0xff] }
 0x147   : > { %2013 = vmatpush1.bf16.msra.mxu0 %v4175_v26  ;;  %v4194_v26 = vcombine.high %v630_v19, %v634_v20  ;;  %v531_v19 = vld [vmem:[#allocation11 + $0x470] sm:$0xff] }
 0x148   : > { %2014 = vmatprep.subr.bf16.mxu0 %v4184_v27  ;;  %2099 = vmatpush1.bf16.msra.mxu1 %v4177_v15  ;;  %v638_v27 = vld [vmem:[#allocation11 + $0x7c8] sm:$0xff]  ;;  %v523_v15 = vld [vmem:[#allocation11 + $0x430] sm:$0xff] }
 0x149   : > { %v4201_v37 = vcombine.low %v638_v27, %v642_v28 }
 0x14b   : > { %2015 = vmatpush1.bf16.msra.mxu0 %v4183_v34  ;;  %v4202_v34 = vcombine.high %v638_v27, %v642_v28  ;;  %v547_v27 = vld [vmem:[#allocation11 + $0x4f0] sm:$0xff] }
 0x14c   : > { %2016 = vmatprep.subr.bf16.mxu0 %v4192_v35  ;;  %v3995_v35 = vcombine.low %v431_v24, %v435_v25 }
 0x14f   : > { %2017 = vmatpush1.bf16.msra.mxu0 %v4191_v42  ;;  %v455_v42 = vld [vmem:[#allocation11 + $0x210] sm:$0xff] }
 0x150   : > { %2018 = vmatprep.subr.bf16.mxu0 %v4200_v43  ;;  %v459_v43 = vld [vmem:[#allocation11 + $0x230] sm:$0xff] }
 0x151   : > { %v4020_v45 = vcombine.high %v455_v42, %v459_v43  ;;  %v4019_v50 = vcombine.low %v455_v42, %v459_v43 }
 0x153   : > { %2019 = vmatpush1.bf16.msra.mxu0 %v4199_v51  ;;  %v4028_v51 = vcombine.high %v463_v47, %v467_v49  ;;  %v591_v49 = vld [vmem:[#allocation11 + $0x650] sm:$0xff] }
 0x154   : > { %2117 = vmatprep.subr.bf16.mxu0 %v3956_v52  ;;  %v471_v52 = vld [vmem:[#allocation11 + $0x290] sm:$0xff] }
 0x155   : > { %v4036_v55 = vcombine.high %v471_v52, %v475_v53  ;;  %v4035_v60 = vcombine.low %v471_v52, %v475_v53  ;;  %v599_v53 = vld [vmem:[#allocation11 + $0x690] sm:$0xff] }
 0x156   : > { %2021 = vmatmul.mubr.bf16.vlgmr.msra.gmra.mrb[0].mxu0 %v5405_v58 }
 0x157   : > { %2118 = vmatpush1.bf16.msra.mxu0 %v3955_v61  ;;  %2149 = vmatprep.mubr.bf16.mxu0 %v5390_v17  ;;  %v4186_v17 = vcombine.high %v622_v11, %v626_v12  ;;  %v4044_v61 = vcombine.high %v479_v57, %v483_v59  ;;  %v515_v11 = vld [vmem:[#allocation11 + $0x3f0] sm:$0xff] }
 0x158   : > { %2119 = vmatprep.subr.bf16.mxu0 %v3964_v62  ;;  %v487_v62 = vld [vmem:[#allocation11 + $0x310] sm:$0xff]  ;;  %v4075_v16 = vcombine.low %v511_v10, %v515_v11 }
 0x159   : > { %2100 = vmatprep.subr.bf16.mxu1 %v4186_v17  ;;  %v4052_v1 = vcombine.high %v487_v62, %v491_v63  ;;  %v4051_v4 = vcombine.low %v487_v62, %v491_v63  ;;  %v527_v17 = vld [vmem:[#allocation11 + $0x450] sm:$0xff] }
 0x15a   : > { %2101 = vmatpush1.bf16.msra.mxu1 %v4185_v23  ;;  %v539_v23 = vld [vmem:[#allocation11 + $0x4b0] sm:$0xff]  ;;  %v4091_v24 = vcombine.low %v527_v17, %v531_v19 }
 0x15b   : > { %2120 = vmatpush1.bf16.msra.mxu0 %v3963_v5  ;;  %2102 = vmatprep.subr.bf16.mxu1 %v4194_v26  ;;  %v4060_v5 = vcombine.high %v495_v2, %v499_v3  ;;  %v543_v26 = vld [vmem:[#allocation11 + $0x4d0] sm:$0xff] }
 0x15c   : > { %2121 = vmatprep.subr.bf16.mxu0 %v3972_v6  ;;  %v503_v6 = vld [vmem:[#allocation11 + $0x390] sm:$0xff]  ;;  %v4107_v32 = vcombine.low %v543_v26, %v547_v27 }
 0x15d   : > { %v4068_v9 = vcombine.high %v503_v6, %v507_v7  ;;  %v4067_v12 = vcombine.low %v503_v6, %v507_v7  ;;  %v607_v59 = vld [vmem:[#allocation11 + $0x6d0] sm:$0xff] }
 0x15e   : > { %2103 = vmatpush1.bf16.msra.mxu1 %v4193_v31  ;;  %v555_v31 = vld [vmem:[#allocation11 + $0x530] sm:$0xff] }
 0x15f   : > { %2122 = vmatpush1.bf16.msra.mxu0 %v3971_v13  ;;  %2104 = vmatprep.subr.bf16.mxu1 %v4202_v34  ;;  %v4076_v13 = vcombine.high %v511_v10, %v515_v11  ;;  %v559_v34 = vld [vmem:[#allocation11 + $0x550] sm:$0xff] }
 0x160   : > { %2123 = vmatprep.subr.bf16.mxu0 %v3980_v14  ;;  %v519_v14 = vld [vmem:[#allocation11 + $0x410] sm:$0xff] }
 0x161   : > { %v4084_v18 = vcombine.high %v519_v14, %v523_v15  ;;  %v4083_v20 = vcombine.low %v519_v14, %v523_v15  ;;  %v615_v63 = vld [vmem:[#allocation11 + $0x710] sm:$0xff] }
 0x162   : > { %2105 = vmatpush1.bf16.msra.mxu1 %v4201_v37  ;;  %v571_v37 = vld [vmem:[#allocation11 + $0x5b0] sm:$0xff] }
 0x163   : > { %2124 = vmatpush1.bf16.msra.mxu0 %v3979_v21  ;;  %v4092_v21 = vcombine.high %v527_v17, %v531_v19  ;;  %v623_v3 = vld [vmem:[#allocation11 + $0x750] sm:$0xff]  ;;  %v2316_v17 = vlaneseq }
 0x164   : > { %2125 = vmatprep.subr.bf16.mxu0 %v3988_v22  ;;  %v535_v22 = vld [vmem:[#allocation11 + $0x490] sm:$0xff] }
 0x165   : > { %2107 = vmatmul.mubr.bf16.vlgmr.msra.gmra.mrb[0].mxu1 %v5405_v58  ;;  %v4100_v25 = vcombine.high %v535_v22, %v539_v23  ;;  %v4099_v28 = vcombine.low %v535_v22, %v539_v23  ;;  %v631_v7 = vld [vmem:[#allocation11 + $0x790] sm:$0xff] }
 0x166   : > { %2235 = vmatprep.mubr.bf16.mxu1 %v4754_v46  ;;  %v639_v11 = vld [vmem:[#allocation11 + $0x7d0] sm:$0xff] }
 0x167   : > { %2126 = vmatpush1.bf16.msra.mxu0 %v3987_v29  ;;  %v4108_v29 = vcombine.high %v543_v26, %v547_v27 }
 0x168   : > { %2127 = vmatprep.subr.bf16.mxu0 %v3996_v30  ;;  %v551_v30 = vld [vmem:[#allocation11 + $0x510] sm:$0xff] }
 0x169   : > { %v4116_v33 = vcombine.high %v551_v30, %v555_v31 }
 0x16b   : > { %2128 = vmatpush1.bf16.msra.mxu0 %v3995_v35  ;;  %v4115_v35 = vcombine.low %v551_v30, %v555_v31 }
 0x16c   : > { %2129 = vmatprep.subr.bf16.mxu0 %v4004_v36  ;;  %v567_v36 = vld [vmem:[#allocation11 + $0x590] sm:$0xff] }
 0x16d   : > { %v4132_v39 = vcombine.high %v567_v36, %v571_v37  ;;  %v4131_v42 = vcombine.low %v567_v36, %v571_v37  ;;  %v404_v37 = vld [vmem:[#allocation11 + $0x78] sm:$0xff] }
 0x16f   : > { %2130 = vmatpush1.bf16.msra.mxu0 %v4003_v40  ;;  %v575_v40 = vld [vmem:[#allocation11 + $0x5d0] sm:$0xff] }
 0x170   : > { %2131 = vmatprep.subr.bf16.mxu0 %v4012_v41  ;;  %v579_v41 = vld [vmem:[#allocation11 + $0x5f0] sm:$0xff] }
 0x171   : > { %v4140_v43 = vcombine.high %v575_v40, %v579_v41  ;;  %v4139_v46 = vcombine.low %v575_v40, %v579_v41  ;;  %v412_v40 = vld [vmem:[#allocation11 + $0xb8] sm:$0xff] }
 0x173   : > { %2132 = vmatpush1.bf16.msra.mxu0 %v4011_v44  ;;  %v583_v44 = vld [vmem:[#allocation11 + $0x610] sm:$0xff] }
 0x174   : > { %2133 = vmatprep.subr.bf16.mxu0 %v4020_v45  ;;  %v587_v45 = vld [vmem:[#allocation11 + $0x630] sm:$0xff] }
 0x175   : > { %v4148_v47 = vcombine.high %v583_v44, %v587_v45 }
 0x177   : > { %2134 = vmatpush1.bf16.msra.mxu0 %v4019_v50  ;;  %v595_v50 = vld [vmem:[#allocation11 + $0x670] sm:$0xff] }
 0x178   : > { %2135 = vmatprep.subr.bf16.mxu0 %v4028_v51  ;;  %v4147_v51 = vcombine.low %v583_v44, %v587_v45  ;;  %v4156_v52 = vcombine.high %v591_v49, %v595_v50 }
 0x17b   : > { %2136 = vmatpush1.bf16.msra.mxu0 %v4027_v54  ;;  %v603_v54 = vld [vmem:[#allocation11 + $0x6b0] sm:$0xff] }
 0x17c   : > { %2137 = vmatprep.subr.bf16.mxu0 %v4036_v55  ;;  %v4155_v55 = vcombine.low %v591_v49, %v595_v50  ;;  %v4164_v57 = vcombine.high %v599_v53, %v603_v54  ;;  %v416_v49 = vld [vmem:[#allocation11 + $0xd8] sm:$0xff] }
 0x17d   : > { %v420_v50 = vld [vmem:[#allocation11 + $0xf8] sm:$0xff] }
 0x17f   : > { %2138 = vmatpush1.bf16.msra.mxu0 %v4035_v60  ;;  %v611_v60 = vld [vmem:[#allocation11 + $0x6f0] sm:$0xff] }
 0x180   : > { %2139 = vmatprep.subr.bf16.mxu0 %v4044_v61  ;;  %v4163_v61 = vcombine.low %v599_v53, %v603_v54  ;;  %v4172_v62 = vcombine.high %v607_v59, %v611_v60 }
 0x183   : > { %2140 = vmatpush1.bf16.msra.mxu0 %v4043_v0  ;;  %v619_v0 = vld [vmem:[#allocation11 + $0x730] sm:$0xff] }
 0x184   : > { %2141 = vmatprep.subr.bf16.mxu0 %v4052_v1  ;;  %v4171_v1 = vcombine.low %v607_v59, %v611_v60  ;;  %v4180_v2 = vcombine.high %v615_v63, %v619_v0  ;;  %v3982_v59 = vcombine.high %v416_v49, %v420_v50 }
 0x187   : > { %2142 = vmatpush1.bf16.msra.mxu0 %v4051_v4  ;;  %v627_v4 = vld [vmem:[#allocation11 + $0x770] sm:$0xff] }
 0x188   : > { %2143 = vmatprep.subr.bf16.mxu0 %v4060_v5  ;;  %v4179_v5 = vcombine.low %v615_v63, %v619_v0  ;;  %v4188_v6 = vcombine.high %v623_v3, %v627_v4  ;;  %v428_v63 = vld [vmem:[#allocation11 + $0x138] sm:$0xff]  ;;  %v3981_v0 = vcombine.low %v416_v49, %v420_v50 }
 0x189   : > { %v488_v50 = vld [vmem:[#allocation11 + $0x318] sm:$0xff] }
 0x18b   : > { %2144 = vmatpush1.bf16.msra.mxu0 %v4059_v8  ;;  %v635_v8 = vld [vmem:[#allocation11 + $0x7b0] sm:$0xff] }
 0x18c   : > { %2145 = vmatprep.subr.bf16.mxu0 %v4068_v9  ;;  %v4187_v9 = vcombine.low %v623_v3, %v627_v4  ;;  %v4196_v10 = vcombine.high %v631_v7, %v635_v8  ;;  %v432_v3 = vld [vmem:[#allocation11 + $0x158] sm:$0xff] }
 0x18d   : > { %v436_v4 = vld [vmem:[#allocation11 + $0x178] sm:$0xff] }
 0x18f   : > { %2146 = vmatpush1.bf16.msra.mxu0 %v4067_v12  ;;  %v643_v12 = vld [vmem:[#allocation11 + $0x7f0] sm:$0xff] }
 0x190   : > { %2147 = vmatprep.subr.bf16.mxu0 %v4076_v13  ;;  %v4195_v13 = vcombine.low %v631_v7, %v635_v8  ;;  %v4204_v14 = vcombine.high %v639_v11, %v643_v12  ;;  %v4203_v15 = vcombine.low %v639_v11, %v643_v12  ;;  %v5439_v7 = vld [vmem:[#allocation7] sm:$0xff]  ;;  %v5443_v12 = vld [vmem:[#allocation5 + $0x8] sm:$0xff] }
 0x191   : > { %v5441_v11 = vld [vmem:[#allocation5] sm:$0xff] }
 0x193   : > { %2148 = vmatpush1.bf16.msra.mxu0 %v4075_v16  ;;  %v5048_v16 = vmov 1935823168  }
 0x194   : > { %2160 = vmatprep.subr.bf16.mxu0 %v4084_v18  ;;  %v2314_v18 = vunpack.c.l.s4 %v5048_v16 }
 0x196   : > { %2150 = vmatmul.mubr.bf16.vlgmr.msra.gmra.mrb[4].mxu0 %v5395_v48  ;;  %v563_v48 = vld [vmem:[#allocation11 + $0x570] sm:$0xff]  ;;  %v2315_v19 = vunpack.c.0.s8 %v2314_v18 }
 0x197   : > { %2161 = vmatpush1.bf16.msra.mxu0 %v4083_v20  ;;  %2192 = vmatprep.mubr.bf16.mxu0 %v5398_v56  ;;  %v4124_v56 = vcombine.high %v559_v34, %v563_v48  ;;  %v4123_v38 = vcombine.low %v559_v34, %v563_v48  ;;  %v5414_v20 = vshrl.u32 %v2316_v17, 7  ;;  %v392_v34 = vld [vmem:[#allocation11 + $0x18] sm:$0xff] }
 0x198   : > { %2162 = vmatprep.subr.bf16.mxu0 %v4092_v21  ;;  %v396_v48 = vld [vmem:[#allocation11 + $0x38] sm:$0xff] }
 0x199   : > { %v2318_v22 = vsub.s32 %v2315_v19, %v5414_v20  ;;  %v3958_v36 = vcombine.high %v392_v34, %v396_v48 }
 0x19b   : > { %2163 = vmatpush1.bf16.msra.mxu0 %v4091_v24  ;;  %2203 = vmatprep.subr.bf16.mxu1 %v3958_v36 }
 0x19c   : > { %2164 = vmatprep.subr.bf16.mxu0 %v4100_v25 }
 0x19f   : > { %2165 = vmatpush1.bf16.msra.mxu0 %v4099_v28 }
 0x1a0   : > { %2166 = vmatprep.subr.bf16.mxu0 %v4108_v29 }
 0x1a3   : > { %2167 = vmatpush1.bf16.msra.mxu0 %v4107_v32 }
 0x1a4   : > { %2168 = vmatprep.subr.bf16.mxu0 %v4116_v33 }
 0x1a7   : > { %2169 = vmatpush1.bf16.msra.mxu0 %v4115_v35  ;;  %v400_v35 = vld [vmem:[#allocation11 + $0x58] sm:$0xff] }
 0x1a8   : > { %2170 = vmatprep.subr.bf16.mxu0 %v4124_v56  ;;  %v3957_v56 = vcombine.low %v392_v34, %v396_v48  ;;  %v460_v34 = vld [vmem:[#allocation11 + $0x238] sm:$0xff] }
 0x1aa   : > { %2204 = vmatpush1.bf16.msra.mxu1 %v3957_v56 }
 0x1ab   : > { %2171 = vmatpush1.bf16.msra.mxu0 %v4123_v38  ;;  %v3966_v38 = vcombine.high %v400_v35, %v404_v37 }
 0x1ac   : > { %2172 = vmatprep.subr.bf16.mxu0 %v4132_v39  ;;  %v408_v39 = vld [vmem:[#allocation11 + $0x98] sm:$0xff] }
 0x1ad   : > { %2205 = vmatprep.subr.bf16.mxu1 %v3966_v38  ;;  %v3974_v44 = vcombine.high %v408_v39, %v412_v40  ;;  %v468_v38 = vld [vmem:[#allocation11 + $0x278] sm:$0xff] }
 0x1af   : > { %2173 = vmatpush1.bf16.msra.mxu0 %v4131_v42  ;;  %v3965_v42 = vcombine.low %v400_v35, %v404_v37  ;;  %v464_v37 = vld [vmem:[#allocation11 + $0x258] sm:$0xff] }
 0x1b0   : > { %2174 = vmatprep.subr.bf16.mxu0 %v4140_v43 }
 0x1b1   : > { %2206 = vmatpush1.bf16.msra.mxu1 %v3965_v42  ;;  %v476_v42 = vld [vmem:[#allocation11 + $0x2b8] sm:$0xff] }
 0x1b2   : > { %2207 = vmatprep.subr.bf16.mxu1 %v3974_v44 }
 0x1b3   : > { %2175 = vmatpush1.bf16.msra.mxu0 %v4139_v46 }
 0x1b4   : > { %2176 = vmatprep.subr.bf16.mxu0 %v4148_v47 }
 0x1b7   : > { %2177 = vmatpush1.bf16.msra.mxu0 %v4147_v51 }
 0x1b8   : > { %2178 = vmatprep.subr.bf16.mxu0 %v4156_v52  ;;  %v3973_v52 = vcombine.low %v408_v39, %v412_v40  ;;  %v4029_v39 = vcombine.low %v464_v37, %v468_v38  ;;  %v4030_v40 = vcombine.high %v464_v37, %v468_v38  ;;  %v560_v38 = vld [vmem:[#allocation11 + $0x558] sm:$0xff] }
 0x1ba   : > { %2208 = vmatpush1.bf16.msra.mxu1 %v3973_v52 }
 0x1bb   : > { %2179 = vmatpush1.bf16.msra.mxu0 %v4155_v55  ;;  %2209 = vmatprep.subr.bf16.mxu1 %v3982_v59 }
 0x1bc   : > { %2180 = vmatprep.subr.bf16.mxu0 %v4164_v57 }
 0x1be   : > { %2210 = vmatpush1.bf16.msra.mxu1 %v3981_v0  ;;  %v508_v0 = vld [vmem:[#allocation11 + $0x3b8] sm:$0xff] }
 0x1bf   : > { %2181 = vmatpush1.bf16.msra.mxu0 %v4163_v61 }
 0x1c0   : > { %2182 = vmatprep.subr.bf16.mxu0 %v4172_v62  ;;  %v424_v62 = vld [vmem:[#allocation11 + $0x118] sm:$0xff] }
 0x1c3   : > { %2183 = vmatpush1.bf16.msra.mxu0 %v4171_v1  ;;  %v3990_v1 = vcombine.high %v424_v62, %v428_v63 }
 0x1c4   : > { %2184 = vmatprep.subr.bf16.mxu0 %v4180_v2  ;;  %v3989_v2 = vcombine.low %v424_v62, %v428_v63  ;;  %v504_v63 = vld [vmem:[#allocation11 + $0x398] sm:$0xff] }
 0x1c5   : > { %2211 = vmatprep.subr.bf16.mxu1 %v3990_v1 }
 0x1c6   : > { %2212 = vmatpush1.bf16.msra.mxu1 %v3989_v2  ;;  %v4070_v2 = vcombine.high %v504_v63, %v508_v0 }
 0x1c7   : > { %2185 = vmatpush1.bf16.msra.mxu0 %v4179_v5  ;;  %v3997_v5 = vcombine.low %v432_v3, %v436_v4 }
 0x1c8   : > { %2186 = vmatprep.subr.bf16.mxu0 %v4188_v6  ;;  %v3998_v6 = vcombine.high %v432_v3, %v436_v4  ;;  %v512_v3 = vld [vmem:[#allocation11 + $0x3d8] sm:$0xff] }
 0x1c9   : > { %v516_v4 = vld [vmem:[#allocation11 + $0x3f8] sm:$0xff] }
 0x1ca   : > { %2213 = vmatprep.subr.bf16.mxu1 %v3998_v6  ;;  %v4078_v6 = vcombine.high %v512_v3, %v516_v4 }
 0x1cb   : > { %2187 = vmatpush1.bf16.msra.mxu0 %v4187_v9  ;;  %2214 = vmatpush1.bf16.msra.mxu1 %v3997_v5  ;;  %v440_v9 = vld [vmem:[#allocation11 + $0x198] sm:$0xff]  ;;  %v4069_v5 = vcombine.low %v504_v63, %v508_v0 }
 0x1cc   : > { %2188 = vmatprep.subr.bf16.mxu0 %v4196_v10  ;;  %v444_v10 = vld [vmem:[#allocation11 + $0x1b8] sm:$0xff] }
 0x1cf   : > { %2189 = vmatpush1.bf16.msra.mxu0 %v4195_v13  ;;  %v5445_v13 = vld [vmem:[#allocation7 + $0x8] sm:$0xff] }
 0x1d0   : > { %2190 = vmatprep.subr.bf16.mxu0 %v4204_v14  ;;  %v4005_v14 = vcombine.low %v440_v9, %v444_v10 }
 0x1d3   : > { %2191 = vmatpush1.bf16.msra.mxu0 %v4203_v15  ;;  %v4006_v15 = vcombine.high %v440_v9, %v444_v10  ;;  %v524_v9 = vld [vmem:[#allocation11 + $0x438] sm:$0xff]  ;;  %v4077_v10 = vcombine.low %v512_v3, %v516_v4 }
 0x1d5   : > { %2215 = vmatprep.subr.bf16.mxu1 %v4006_v15  ;;  %v528_v15 = vld [vmem:[#allocation11 + $0x458] sm:$0xff] }
 0x1d6   : > { %2193 = vmatmul.mubr.bf16.vlgmr.msra.gmra.mrb[4].mxu0 %v5405_v58  ;;  %2216 = vmatpush1.bf16.msra.mxu1 %v4005_v14 }
 0x229   : > { %v2022_v21 = vpop.f32.mrb[0].mxu0 }
 0x22a   : > { %v2024_v23 = vpop.f32.mrb[1].mxu0 }
 0x22b   : > { %v2305_v24 = vcombine.low %v2022_v21, %v2024_v23  ;;  %v2306_v25 = vcombine.high %v2022_v21, %v2024_v23  ;;  %v2026_v26 = vpop.f32.mrb[2].mxu0  ;;  %v452_v23 = vld [vmem:[#allocation11 + $0x1f8] sm:$0xff] }
 0x22c   : > { %v2028_v27 = vpop.f32.mrb[3].mxu0 }
 0x22d   : > { %v2307_v28 = vcombine.low %v2026_v26, %v2028_v27  ;;  %v2308_v29 = vcombine.high %v2026_v26, %v2028_v27  ;;  %v5417_v30 = vrot.slane %v2305_v24, %v2318_v22  ;;  %v5423_v32 = vrot.slane %v2306_v25, %v2318_v22 }
 0x22f   : > { %v5419_v31 = vrot.slane %v2307_v28, %v2318_v22  ;;  %2345 = vrot.lane.b32.xlu1 %v5417_v30, %s5049_s8  ;;  %v5427_v33 = vrot.slane %v2308_v29, %v2318_v22  ;;  %v2341_v17 = vmul.f32 %v5417_v30, %v5441_v11  ;;  %v2342_v19 = vmul.f32 %v5423_v32, %v5443_v12 }
 0x233   : > { %2347 = vrot.lane.b32.xlu1 %v5423_v32, %s5049_s8  ;;  %v456_v32 = vld [vmem:[#allocation11 + $0x218] sm:$0xff] }
 0x234   : > { %v4021_v35 = vcombine.low %v456_v32, %v460_v34  ;;  %v4022_v56 = vcombine.high %v456_v32, %v460_v34  ;;  %v552_v34 = vld [vmem:[#allocation11 + $0x518] sm:$0xff] }
 0x237   : > { %2351 = vrot.lane.b32.xlu1 %v5427_v33, %s5049_s8 }
 0x238   : > { %v2108_v41 = vpop.f32.mrb[0].mxu1 }
 0x239   : > { %v2110_v43 = vpop.f32.mrb[1].mxu1 }
 0x23a   : > { %v2558_v45 = vcombine.low %v2108_v41, %v2110_v43  ;;  %v2559_v46 = vcombine.high %v2108_v41, %v2110_v43  ;;  %v2112_v47 = vpop.f32.mrb[2].mxu1  ;;  %v472_v41 = vld [vmem:[#allocation11 + $0x298] sm:$0xff] }
 0x23b   : > { %v2114_v51 = vpop.f32.mrb[3].mxu1  ;;  %v4038_v43 = vcombine.high %v472_v41, %v476_v42  ;;  %v4037_v44 = vcombine.low %v472_v41, %v476_v42  ;;  %v568_v42 = vld [vmem:[#allocation11 + $0x598] sm:$0xff] }
 0x23c   : > { %v5431_v53 = vrot.slane %v2558_v45, %v2318_v22  ;;  %v5433_v54 = vrot.slane %v2559_v46, %v2318_v22  ;;  %v2560_v55 = vcombine.low %v2112_v47, %v2114_v51  ;;  %v2561_v57 = vcombine.high %v2112_v47, %v2114_v51  ;;  %v480_v45 = vld [vmem:[#allocation11 + $0x2d8] sm:$0xff] }
 0x23d   : > { %v484_v46 = vld [vmem:[#allocation11 + $0x2f8] sm:$0xff] }
 0x23e   : > { %v5435_v60 = vrot.slane %v2560_v55, %v2318_v22  ;;  %v5437_v61 = vrot.slane %v2561_v57, %v2318_v22  ;;  %v448_v22 = vld [vmem:[#allocation11 + $0x1d8] sm:$0xff]  ;;  %v4045_v47 = vcombine.low %v480_v45, %v484_v46  ;;  %v4046_v49 = vcombine.high %v480_v45, %v484_v46 }
 0x23f   : > { %v4014_v24 = vcombine.high %v448_v22, %v452_v23  ;;  %v4013_v27 = vcombine.low %v448_v22, %v452_v23  ;;  %v492_v51 = vld [vmem:[#allocation11 + $0x338] sm:$0xff]  ;;  %v4755_v22 = vld [vmem:[%s5371_s29] ss:$16 sps:$4 sm:$0xff]  }
 0x240   : > { %v4054_v52 = vcombine.high %v488_v50, %v492_v51  ;;  %v496_v55 = vld [vmem:[#allocation11 + $0x358] sm:$0xff]  ;;  %v4053_v59 = vcombine.low %v488_v50, %v492_v51 }
 0x241   : > { %2217 = vmatprep.subr.bf16.mxu1 %v4014_v24  ;;  %v500_v57 = vld [vmem:[#allocation11 + $0x378] sm:$0xff] }
 0x242   : > { %2218 = vmatpush1.bf16.msra.mxu1 %v4013_v27  ;;  %v4062_v62 = vcombine.high %v496_v55, %v500_v57  ;;  %v4061_v1 = vcombine.low %v496_v55, %v500_v57  ;;  %v4756_v24 = vld [vmem:[%s5371_s29 + $0xc] ss:$16 sps:$4 sm:$0xff]  }
 0x243   : > { %2219 = vmatprep.subr.bf16.mxu1 %v4022_v56  ;;  %v548_v27 = vld [vmem:[#allocation11 + $0x4f8] sm:$0xff] }
 0x244   : > { %v576_v46 = vld [vmem:[#allocation11 + $0x5d8] sm:$0xff] }
 0x245   : > { %v584_v51 = vld [vmem:[#allocation11 + $0x618] sm:$0xff] }
 0x246   : > { %2220 = vmatpush1.bf16.msra.mxu1 %v4021_v35  ;;  %v556_v35 = vld [vmem:[#allocation11 + $0x538] sm:$0xff] }
 0x247   : > { %2221 = vmatprep.subr.bf16.mxu1 %v4030_v40  ;;  %v4118_v37 = vcombine.high %v552_v34, %v556_v35  ;;  %v4117_v40 = vcombine.low %v552_v34, %v556_v35 }
 0x24a   : > { %2222 = vmatpush1.bf16.msra.mxu1 %v4029_v39  ;;  %v564_v39 = vld [vmem:[#allocation11 + $0x578] sm:$0xff] }
 0x24b   : > { %2223 = vmatprep.subr.bf16.mxu1 %v4038_v43  ;;  %v4126_v41 = vcombine.high %v560_v38, %v564_v39  ;;  %v572_v43 = vld [vmem:[#allocation11 + $0x5b8] sm:$0xff] }
 0x24c   : > { %v4134_v45 = vcombine.high %v568_v42, %v572_v43 }
 0x24e   : > { %2224 = vmatpush1.bf16.msra.mxu1 %v4037_v44  ;;  %v4125_v44 = vcombine.low %v560_v38, %v564_v39  ;;  %v2297_v38 = vld [vmem:[#allocation8] sm:$0xff]  ;;  %v2298_v39 = vld [vmem:[#allocation8 + $0x8] sm:$0xff] }
 0x24f   : > { %2225 = vmatprep.subr.bf16.mxu1 %v4046_v49  ;;  %v4133_v49 = vcombine.low %v568_v42, %v572_v43 }
 0x252   : > { %2226 = vmatpush1.bf16.msra.mxu1 %v4045_v47  ;;  %v580_v47 = vld [vmem:[#allocation11 + $0x5f8] sm:$0xff] }
 0x253   : > { %2227 = vmatprep.subr.bf16.mxu1 %v4054_v52  ;;  %v4142_v50 = vcombine.high %v576_v46, %v580_v47  ;;  %v588_v52 = vld [vmem:[#allocation11 + $0x638] sm:$0xff]  ;;  %v4141_v55 = vcombine.low %v576_v46, %v580_v47  ;;  %v2295_v47 = vld [vmem:[#allocation7 + $0x10] sm:$0xff] }
 0x254   : > { %v4150_v57 = vcombine.high %v584_v51, %v588_v52  ;;  %v4149_v63 = vcombine.low %v584_v51, %v588_v52  ;;  %v2296_v51 = vld [vmem:[#allocation7 + $0x18] sm:$0xff]  ;;  %v2291_v52 = vld [vmem:[#allocation5 + $0x10] sm:$0xff] }
 0x256   : > { %2228 = vmatpush1.bf16.msra.mxu1 %v4053_v59  ;;  %v592_v59 = vld [vmem:[#allocation11 + $0x658] sm:$0xff] }
 0x257   : > { %2229 = vmatprep.subr.bf16.mxu1 %v4062_v62  ;;  %v596_v62 = vld [vmem:[#allocation11 + $0x678] sm:$0xff] }
 0x258   : > { %v4158_v0 = vcombine.high %v592_v59, %v596_v62  ;;  %v4157_v3 = vcombine.low %v592_v59, %v596_v62 }
 0x25a   : > { %2230 = vmatpush1.bf16.msra.mxu1 %v4061_v1  ;;  %v600_v1 = vld [vmem:[#allocation11 + $0x698] sm:$0xff] }
 0x25b   : > { %2231 = vmatprep.subr.bf16.mxu1 %v4070_v2  ;;  %v604_v2 = vld [vmem:[#allocation11 + $0x6b8] sm:$0xff] }
 0x25c   : > { %v4166_v4 = vcombine.high %v600_v1, %v604_v2 }
 0x25e   : > { %2232 = vmatpush1.bf16.msra.mxu1 %v4069_v5  ;;  %v608_v5 = vld [vmem:[#allocation11 + $0x6d8] sm:$0xff] }
 0x25f   : > { %2233 = vmatprep.subr.bf16.mxu1 %v4078_v6  ;;  %v612_v6 = vld [vmem:[#allocation11 + $0x6f8] sm:$0xff] }
 0x262   : > { %2234 = vmatpush1.bf16.msra.mxu1 %v4077_v10  ;;  %v616_v10 = vld [vmem:[#allocation11 + $0x718] sm:$0xff] }
 0x265   : > { %2236 = vmatmul.mubr.bf16.vlgmr.msra.gmra.mrb[4].mxu1 %v4755_v22  ;;  %v632_v22 = vld [vmem:[#allocation11 + $0x798] sm:$0xff] }
 0x266   : > { %2278 = vmatprep.mubr.bf16.mxu1 %v4756_v24 }
 0x2a1   : > { %v2346_v8 = vpop.permute.xlu1 %2345 }
 0x2a2   : > { %v2353_v16 = vmul.f32 %v2346_v8, %v5439_v7  ;;  %v520_v8 = vld [vmem:[#allocation11 + $0x418] sm:$0xff] }
 0x2a3   : > { %v4086_v14 = vcombine.high %v520_v8, %v524_v9 }
 0x2a4   : > { %v2357_v25 = vadd.f32 %v2353_v16, %v2341_v17  ;;  %v532_v16 = vld [vmem:[#allocation11 + $0x478] sm:$0xff] }
 0x2a5   : > { %v2348_v18 = vpop.permute.xlu1 %2347  ;;  %2246 = vmatprep.subr.bf16.mxu1 %v4086_v14  ;;  %v4094_v17 = vcombine.high %v528_v15, %v532_v16  ;;  %v4093_v23 = vcombine.low %v528_v15, %v532_v16  ;;  %v620_v14 = vld [vmem:[#allocation11 + $0x738] sm:$0xff]  ;;  %v4173_v15 = vcombine.low %v608_v5, %v612_v6 }
 0x2a6   : > { %v2354_v21 = vmul.f32 %v2348_v18, %v5445_v13  ;;  %v4085_v18 = vcombine.low %v520_v8, %v524_v9  ;;  %v4165_v8 = vcombine.low %v600_v1, %v604_v2  ;;  %v4174_v9 = vcombine.high %v608_v5, %v612_v6 }
 0x2a7   : > { %v4182_v16 = vcombine.high %v616_v10, %v620_v14  ;;  %v2343_v1 = vmul.f32 %v5419_v31, %v2291_v52 }
 0x2a8   : > { %v2358_v26 = vadd.f32 %v2354_v21, %v2342_v19  ;;  %v536_v19 = vld [vmem:[#allocation11 + $0x498] sm:$0xff]  ;;  %2247 = vmatpush1.bf16.msra.mxu1 %v4085_v18 }
 0x2a9   : > { %v5453_v28 = vpop.f32.mrb[4].mxu0  ;;  %v540_v21 = vld [vmem:[#allocation11 + $0x4b8] sm:$0xff]  ;;  %2248 = vmatprep.subr.bf16.mxu1 %v4094_v17  ;;  %v2352_v35 = vpop.permute.xlu1 %2351 }
 0x2aa   : > { %2363 = vrot.lane.b32.xlu0 %v5453_v28, %s5049_s8  ;;  %v5457_v29 = vpop.f32.mrb[5].mxu0  ;;  %v2371_v30 = vpack.c.bf16 %v2358_v26, %v2357_v25  ;;  %v4102_v25 = vcombine.high %v536_v19, %v540_v21  ;;  %v544_v26 = vld [vmem:[#allocation11 + $0x4d8] sm:$0xff] }
 0x2ab   : > { %v5459_v48 = vpop.f32.mrb[6].mxu0  ;;  %v4110_v32 = vcombine.high %v544_v26, %v548_v27  ;;  %v4109_v56 = vcombine.low %v544_v26, %v548_v27  ;;  %v624_v18 = vld [vmem:[#allocation11 + $0x758] sm:$0xff] }
 0x2ac   : > { %v5461_v36 = vpop.f32.mrb[7].mxu0  ;;  %4360 = vmatprep.mubr.bf16.mxu0 %v2371_v30  ;;  %2249 = vmatpush1.bf16.msra.mxu1 %v4093_v23  ;;  %v4101_v30 = vcombine.low %v536_v19, %v540_v21  ;;  %v628_v17 = vld [vmem:[#allocation11 + $0x778] sm:$0xff]  ;;  %v4181_v19 = vcombine.low %v616_v10, %v620_v14  ;;  %v2595_v14 = vmul.f32 %v5433_v54, %v5443_v12 }
 0x2ad   : > { %2618 = vrot.lane.b32.xlu1 %v5461_v36, %s5049_s8  ;;  %2250 = vmatprep.subr.bf16.mxu1 %v4102_v25  ;;  %v4190_v21 = vcombine.high %v624_v18, %v628_v17  ;;  %v636_v23 = vld [vmem:[#allocation11 + $0x7b8] sm:$0xff]  ;;  %v4189_v24 = vcombine.low %v624_v18, %v628_v17 }
 0x2ae   : > { %2365 = vrot.lane.b32.xlu0 %v5459_v48, %s5049_s8  ;;  %v4198_v25 = vcombine.high %v632_v22, %v636_v23  ;;  %v640_v26 = vld [vmem:[#allocation11 + $0x7d8] sm:$0xff] }
 0x2af   : > { %v644_v27 = vld [vmem:[#allocation11 + $0x7f8] sm:$0xff] }
 0x2b0   : > { %2251 = vmatpush1.bf16.msra.mxu1 %v4101_v30  ;;  %v4197_v30 = vcombine.low %v632_v22, %v636_v23  ;;  %v4205_v34 = vcombine.low %v640_v26, %v644_v27 }
 0x2b1   : > { %2600 = vrot.lane.b32.xlu1 %v5433_v54, %s5049_s8  ;;  %2252 = vmatprep.subr.bf16.mxu1 %v4110_v32  ;;  %v4206_v32 = vcombine.high %v640_v26, %v644_v27  ;;  %v2596_v54 = vmul.f32 %v5435_v60, %v2291_v52 }
 0x2b2   : > { %2349 = vrot.lane.b32.xlu0 %v5419_v31, %s5049_s8 }
 0x2b4   : > { %2253 = vmatpush1.bf16.msra.mxu1 %v4109_v56  ;;  %v2299_v56 = vld [vmem:[#allocation10] sm:$0xff] }
 0x2b5   : > { %2604 = vrot.lane.b32.xlu1 %v5437_v61, %s5049_s8  ;;  %2254 = vmatprep.subr.bf16.mxu1 %v4118_v37 }
 0x2b6   : > { %2616 = vrot.lane.b32.xlu0 %v5457_v29, %s5049_s8 }
 0x2b8   : > { %2255 = vmatpush1.bf16.msra.mxu1 %v4117_v40  ;;  %v2300_v40 = vld [vmem:[#allocation10 + $0x8] sm:$0xff] }
 0x2b9   : > { %2256 = vmatprep.subr.bf16.mxu1 %v4126_v41 }
 0x2ba   : > { %2598 = vrot.lane.b32.xlu0 %v5431_v53, %s5049_s8 }
 0x2bc   : > { %2257 = vmatpush1.bf16.msra.mxu1 %v4125_v44  ;;  %v2361_v44 = vmul.f32 %v2297_v38, %v5453_v28 }
 0x2bd   : > { %2258 = vmatprep.subr.bf16.mxu1 %v4134_v45  ;;  %v2362_v45 = vmul.f32 %v2298_v39, %v5459_v48  ;;  %v2614_v48 = vmul.f32 %v2297_v38, %v5457_v29 }
 0x2be   : > { %2602 = vrot.lane.b32.xlu0 %v5435_v60, %s5049_s8 }
 0x2c0   : > { %2259 = vmatpush1.bf16.msra.mxu1 %v4133_v49 }
 0x2c1   : > { %2260 = vmatprep.subr.bf16.mxu1 %v4142_v50 }
 0x2c4   : > { %2261 = vmatpush1.bf16.msra.mxu1 %v4141_v55  ;;  %v2292_v55 = vld [vmem:[#allocation5 + $0x18] sm:$0xff] }
 0x2c5   : > { %2262 = vmatprep.subr.bf16.mxu1 %v4150_v57  ;;  %v2344_v28 = vmul.f32 %v5427_v33, %v2292_v55  ;;  %v2594_v33 = vmul.f32 %v5431_v53, %v5441_v11 }
 0x2c8   : > { %2263 = vmatpush1.bf16.msra.mxu1 %v4149_v63  ;;  %v2356_v63 = vmul.f32 %v2352_v35, %v2296_v51 }
 0x2c9   : > { %2264 = vmatprep.subr.bf16.mxu1 %v4158_v0 }
 0x2ca   : > { %v2360_v6 = vadd.f32 %v2356_v63, %v2344_v28 }
 0x2cc   : > { %2265 = vmatpush1.bf16.msra.mxu1 %v4157_v3  ;;  %v2615_v3 = vmul.f32 %v2298_v39, %v5461_v36 }
 0x2cd   : > { %2266 = vmatprep.subr.bf16.mxu1 %v4166_v4 }
 0x2d0   : > { %2267 = vmatpush1.bf16.msra.mxu1 %v4165_v8 }
 0x2d1   : > { %2268 = vmatprep.subr.bf16.mxu1 %v4174_v9 }
 0x2d4   : > { %2269 = vmatpush1.bf16.msra.mxu1 %v4173_v15 }
 0x2d5   : > { %2270 = vmatprep.subr.bf16.mxu1 %v4182_v16 }
 0x2d8   : > { %2271 = vmatpush1.bf16.msra.mxu1 %v4181_v19 }
 0x2d9   : > { %2272 = vmatprep.subr.bf16.mxu1 %v4190_v21 }
 0x2dc   : > { %2273 = vmatpush1.bf16.msra.mxu1 %v4189_v24 }
 0x2dd   : > { %2274 = vmatprep.subr.bf16.mxu1 %v4198_v25 }
 0x2e0   : > { %2275 = vmatpush1.bf16.msra.mxu1 %v4197_v30 }
 0x2e1   : > { %2276 = vmatprep.subr.bf16.mxu1 %v4206_v32 }
 0x2e4   : > { %2277 = vmatpush1.bf16.msra.mxu1 %v4205_v34 }
 0x2e7   : > { %2279 = vmatmul.mubr.bf16.vlgmr.msra.gmra.mrb[4].mxu1 %v5405_v58 }
 0x31c   : > { %v2364_v37 = vpop.permute.xlu0 %2363 }
 0x31d   : > { %v2367_v41 = vmul.f32 %v2364_v37, %v2299_v56 }
 0x31f   : > { %v2619_v42 = vpop.permute.xlu1 %2618  ;;  %v2369_v49 = vadd.f32 %v2367_v41, %v2361_v44 }
 0x320   : > { %v2366_v43 = vpop.permute.xlu0 %2365  ;;  %v2621_v0 = vmul.f32 %v2619_v42, %v2300_v40 }
 0x321   : > { %v2368_v46 = vmul.f32 %v2366_v43, %v2300_v40 }
 0x322   : > { %v2623_v8 = vadd.f32 %v2621_v0, %v2615_v3 }
 0x323   : > { %v2370_v50 = vadd.f32 %v2368_v46, %v2362_v45  ;;  %v2601_v62 = vpop.permute.xlu1 %2600 }
 0x324   : > { %v2350_v58 = vpop.permute.xlu0 %2349  ;;  %v2607_v9 = vmul.f32 %v2601_v62, %v5445_v13  ;;  %v2597_v13 = vmul.f32 %v5437_v61, %v2292_v55 }
 0x325   : > { %v2355_v57 = vmul.f32 %v2350_v58, %v2295_v47  ;;  %v2373_v59 = vpack.c.bf16 %v2370_v50, %v2369_v49 }
 0x326   : > { %v2611_v36 = vadd.f32 %v2607_v9, %v2595_v14 }
 0x327   : > { %4358 = vmatprep.subr.bf16.mxu0 %v2373_v59  ;;  %v2359_v4 = vadd.f32 %v2355_v57, %v2343_v1  ;;  %v2605_v31 = vpop.permute.xlu1 %2604 }
 0x328   : > { %v2617_v2 = vpop.permute.xlu0 %2616  ;;  %4359 = vmatpush3.bf16.xpose.msra.mxu0 %v2373_v59  ;;  %v2609_v17 = vmul.f32 %v2605_v31, %v2296_v51 }
 0x329   : > { %v2620_v5 = vmul.f32 %v2617_v2, %v2299_v56  ;;  %v2372_v16 = vpack.c.bf16 %v2360_v6, %v2359_v4 }
 0x32a   : > { %v2613_v23 = vadd.f32 %v2609_v17, %v2597_v13 }
 0x32b   : > { %v2622_v10 = vadd.f32 %v2620_v5, %v2614_v48 }
 0x32c   : > { %v2599_v15 = vpop.permute.xlu0 %2598 }
 0x32d   : > { %v2606_v29 = vmul.f32 %v2599_v15, %v5439_v7  ;;  %v2626_v18 = vpack.c.bf16 %v2623_v8, %v2622_v10 }
 0x32f   : > { %v2610_v19 = vadd.f32 %v2606_v29, %v2594_v33  ;;  %4361 = vmatmul.mubr.bf16.vlgmr.msra.gmra.mrb[8].mxu0 %v2372_v16  ;;  %4370 = vmatprep.subr.bf16.mxu0 %v2626_v18 }
 0x330   : > { %v2603_v21 = vpop.permute.xlu0 %2602  ;;  %4371 = vmatpush3.bf16.xpose.msra.mxu0 %v2626_v18 }
 0x331   : > { %v2608_v12 = vmul.f32 %v2603_v21, %v2295_v47  ;;  %v2624_v22 = vpack.c.bf16 %v2611_v36, %v2610_v19 }
 0x333   : > { %v2612_v24 = vadd.f32 %v2608_v12, %v2596_v54  ;;  %4372 = vmatprep.mubr.bf16.mxu0 %v2624_v22 }
 0x335   : > { %v2625_v53 = vpack.c.bf16 %v2613_v23, %v2612_v24 }
 0x337   : > { %4373 = vmatmul.mubr.bf16.vlgmr.msra.gmra.mrb[12].mxu0 %v2625_v53 }
 0x3ba   : > { %v2280_v7 = vpop.f32.mrb[4].mxu1 }
 0x3bb   : > { %v2282_v11 = vpop.f32.mrb[5].mxu1 }
 0x3bc   : > { %v2284_v25 = vpop.f32.mrb[6].mxu1 }
 0x3bd   : > { %v2374_v26 = vpack.c.bf16 %v2284_v25, %v2280_v7  ;;  %v2286_v27 = vpop.f32.mrb[7].mxu1 }
 0x3be   : > { %v5496_v30 = vpack.c.bf16 %v2286_v27, %v2282_v11  ;;  %v4532_v27 = vld [vmem:[#allocation13 + $0x4] ss:$16 sps:$4 sm:$0xff]  }
 0x3bf   : > { %4364 = vmatprep.subr.bf16.mxu1 %v2374_v26  ;;  %3602 = vmatprep.subr.bf16.mxu0 %v4532_v27  ;;  %v4628_v27 = vld [vmem:[#allocation13 + $0x204] ss:$16 sps:$4 sm:$0xff]  }
 0x3c0   : > { %4365 = vmatpush3.bf16.msra.mxu1 %v2374_v26  ;;  %v4530_v26 = vld [vmem:[#allocation13] ss:$16 sps:$4 sm:$0xff]  }
 0x3c1   : > { %4376 = vmatprep.subr.bf16.mxu1 %v5496_v30  ;;  %3603 = vmatpush1.bf16.msra.mxu0 %v4530_v26  ;;  %v4623_v26 = vld [vmem:[#allocation13 + $0x1e8] ss:$16 sps:$4 sm:$0xff]  }
 0x402   : > { %v4362_v60 = vpop.f32.mrb[8].mxu0 }
 0x403   : > { %v2409_v61 = vpop.f32.mrb[9].mxu0  ;;  %v2431_v37 = vsel %vm2424_vm0, %v4362_v60, -inf }
 0x404   : > { %v4363_v32 = vpop.f32.mrb[10].mxu0  ;;  %v2425_v34 = vsel %vm2424_vm0, %v2409_v61, -inf }
 0x405   : > { %2426 = vmax.xlane.f32.xlu0 %v2425_v34  ;;  %v2412_v35 = vpop.f32.mrb[11].mxu0  ;;  %v2434_v41 = vsel %vm2424_vm0, %v4363_v32, -inf  ;;  %v4536_v34 = vld [vmem:[#allocation13 + $0x20] ss:$16 sps:$4 sm:$0xff]  }
 0x406   : > { %v2428_v56 = vsel %vm2424_vm0, %v2412_v35, -inf }
 0x407   : > { %2429 = vmax.xlane.f32.xlu1 %v2428_v56  ;;  %v4544_v56 = vld [vmem:[#allocation13 + $0x44] ss:$16 sps:$4 sm:$0xff]  }
 0x409   : > { %2432 = vmax.xlane.f32.xlu0 %v2431_v37  ;;  %v4547_v37 = vld [vmem:[#allocation13 + $0x4c] ss:$16 sps:$4 sm:$0xff]  }
 0x40a   : > { %v4374_v38 = vpop.f32.mrb[12].mxu0 }
 0x40b   : > { %v2662_v39 = vpop.f32.mrb[13].mxu0  ;;  %v2683_v45 = vsel %vm2424_vm0, %v4374_v38, -inf }
 0x40c   : > { %v4375_v40 = vpop.f32.mrb[14].mxu0  ;;  %v2677_v42 = vsel %vm2424_vm0, %v2662_v39, -inf }
 0x40d   : > { %2435 = vmax.xlane.f32.xlu0 %v2434_v41  ;;  %v2665_v43 = vpop.f32.mrb[15].mxu0  ;;  %2678 = vmax.xlane.f32.xlu1 %v2677_v42  ;;  %v2686_v46 = vsel %vm2424_vm0, %v4375_v40, -inf  ;;  %v4553_v41 = vld [vmem:[#allocation13 + $0x6c] ss:$16 sps:$4 sm:$0xff]   ;;  %v4548_v42 = vld [vmem:[#allocation13 + $0x60] ss:$16 sps:$4 sm:$0xff]  }
 0x40e   : > { %v2680_v44 = vsel %vm2424_vm0, %v2665_v43, -inf }
 0x411   : > { %2681 = vmax.xlane.f32.xlu0 %v2680_v44  ;;  %2684 = vmax.xlane.f32.xlu1 %v2683_v45  ;;  %v4556_v44 = vld [vmem:[#allocation13 + $0x84] ss:$16 sps:$4 sm:$0xff]   ;;  %v4559_v45 = vld [vmem:[#allocation13 + $0x8c] ss:$16 sps:$4 sm:$0xff]  }
 0x415   : > { %2687 = vmax.xlane.f32.xlu0 %v2686_v46  ;;  %v4554_v46 = vld [vmem:[#allocation13 + $0x80] ss:$16 sps:$4 sm:$0xff]  }
 0x492   : > { %v2427_v47 = vpop.xlane.xlu0 %2426 }
 0x493   : > { %v2437_v49 = vsub.f32 %v2409_v61, %v2427_v47  ;;  %v4538_v61 = vld [vmem:[#allocation13 + $0x24] ss:$16 sps:$4 sm:$0xff]   ;;  %v4557_v47 = vld [vmem:[#allocation13 + $0x88] ss:$16 sps:$4 sm:$0xff]  }
 0x494   : > { %v2430_v50 = vpop.xlane.xlu1 %2429  ;;  %3604 = vmatprep.subr.bf16.mxu0 %v4538_v61 }
 0x495   : > { %v2441_v51 = vmul.f32 1.442695, %v2437_v49  ;;  %v2438_v52 = vsub.f32 %v2412_v35, %v2430_v50  ;;  %v4539_v35 = vld [vmem:[#allocation13 + $0x28] ss:$16 sps:$4 sm:$0xff]   ;;  %3605 = vmatpush1.bf16.msra.mxu0 %v4536_v34  ;;  %v4562_v49 = vld [vmem:[#allocation13 + $0xa4] ss:$16 sps:$4 sm:$0xff]  }
 0x496   : > { %v2433_v58 = vpop.xlane.xlu0 %2432  ;;  %3606 = vmatprep.subr.bf16.mxu0 %v4544_v56  ;;  %v4565_v50 = vld [vmem:[#allocation13 + $0xac] ss:$16 sps:$4 sm:$0xff]  }
 0x497   : > { %4722 = vpow2.f32 %v2441_v51  ;;  %v2443_v55 = vmul.f32 1.442695, %v2438_v52  ;;  %v2439_v57 = vsub.f32 %v4362_v60, %v2433_v58  ;;  %v4535_v60 = vld [vmem:[#allocation13 + $0xc] ss:$16 sps:$4 sm:$0xff]   ;;  %v4560_v51 = vld [vmem:[#allocation13 + $0xa0] ss:$16 sps:$4 sm:$0xff]  }
 0x498   : > { %v4563_v52 = vld [vmem:[#allocation13 + $0xa8] ss:$16 sps:$4 sm:$0xff]   ;;  %v4568_v58 = vld [vmem:[#allocation13 + $0xc4] ss:$16 sps:$4 sm:$0xff]  }
 0x499   : > { %4724 = vpow2.f32 %v2443_v55  ;;  %v2445_v59 = vmul.f32 1.442695, %v2439_v57  ;;  %v4571_v55 = vld [vmem:[#allocation13 + $0xcc] ss:$16 sps:$4 sm:$0xff]   ;;  %v4566_v57 = vld [vmem:[#allocation13 + $0xc0] ss:$16 sps:$4 sm:$0xff]  }
 0x49a   : > { %v2436_v62 = vpop.xlane.xlu0 %2435  ;;  %v2679_v63 = vpop.xlane.xlu1 %2678 }
 0x49b   : > { %4726 = vpow2.f32 %v2445_v59  ;;  %v2440_v0 = vsub.f32 %v4363_v32, %v2436_v62  ;;  %v2689_v1 = vsub.f32 %v2662_v39, %v2679_v63  ;;  %v4541_v32 = vld [vmem:[#allocation13 + $0x2c] ss:$16 sps:$4 sm:$0xff]   ;;  %v4545_v39 = vld [vmem:[#allocation13 + $0x48] ss:$16 sps:$4 sm:$0xff]   ;;  %v4574_v62 = vld [vmem:[#allocation13 + $0xe4] ss:$16 sps:$4 sm:$0xff]  }
 0x49c   : > { %v4569_v59 = vld [vmem:[#allocation13 + $0xc8] ss:$16 sps:$4 sm:$0xff]   ;;  %v4577_v63 = vld [vmem:[#allocation13 + $0xec] ss:$16 sps:$4 sm:$0xff]  }
 0x49d   : > { %v2447_v28 = vmul.f32 1.442695, %v2440_v0  ;;  %v2693_v2 = vmul.f32 1.442695, %v2689_v1  ;;  %v4572_v0 = vld [vmem:[#allocation13 + $0xe0] ss:$16 sps:$4 sm:$0xff]  }
 0x49e   : > { %v2682_v48 = vpop.xlane.xlu0 %2681  ;;  %v2685_v3 = vpop.xlane.xlu1 %2684  ;;  %v4575_v1 = vld [vmem:[#allocation13 + $0xe8] ss:$16 sps:$4 sm:$0xff]  }
 0x49f   : > { %4728 = vpow2.f32 %v2447_v28  ;;  %v2690_v4 = vsub.f32 %v2665_v43, %v2682_v48  ;;  %v2691_v5 = vsub.f32 %v4374_v38, %v2685_v3  ;;  %v4542_v38 = vld [vmem:[#allocation13 + $0x40] ss:$16 sps:$4 sm:$0xff]   ;;  %v4551_v43 = vld [vmem:[#allocation13 + $0x68] ss:$16 sps:$4 sm:$0xff]   ;;  %v4580_v28 = vld [vmem:[#allocation13 + $0x104] ss:$16 sps:$4 sm:$0xff]  }
 0x4a0   : > { %4730 = vpow2.f32 %v2693_v2  ;;  %3607 = vmatpush1.bf16.msra.mxu0 %v4542_v38  ;;  %v4583_v2 = vld [vmem:[#allocation13 + $0x10c] ss:$16 sps:$4 sm:$0xff]   ;;  %v4578_v48 = vld [vmem:[#allocation13 + $0x100] ss:$16 sps:$4 sm:$0xff]   ;;  %v4581_v3 = vld [vmem:[#allocation13 + $0x108] ss:$16 sps:$4 sm:$0xff]  }
 0x4a1   : > { %v4723_v6 = vpop.eup %4722  ;;  %v2695_v8 = vmul.f32 1.442695, %v2690_v4  ;;  %v2697_v9 = vmul.f32 1.442695, %v2691_v5  ;;  %v4586_v4 = vld [vmem:[#allocation13 + $0x124] ss:$16 sps:$4 sm:$0xff]  }
 0x4a2   : > { %v2688_v10 = vpop.xlane.xlu0 %2687  ;;  %v2449_v14 = vsel %vm2424_vm0, %v4723_v6, 0.0  ;;  %v4589_v5 = vld [vmem:[#allocation13 + $0x12c] ss:$16 sps:$4 sm:$0xff]  }
 0x4a3   : > { %v4725_v31 = vpop.eup %4724  ;;  %4732 = vpow2.f32 %v2695_v8  ;;  %v2692_v15 = vsub.f32 %v4375_v40, %v2688_v10  ;;  %2450 = vadd.xlane.f32.xlu1 %v2449_v14  ;;  %v4550_v40 = vld [vmem:[#allocation13 + $0x64] ss:$16 sps:$4 sm:$0xff]   ;;  %v4587_v8 = vld [vmem:[#allocation13 + $0x128] ss:$16 sps:$4 sm:$0xff]   ;;  %v4595_v10 = vld [vmem:[#allocation13 + $0x14c] ss:$16 sps:$4 sm:$0xff]  }
 0x4a4   : > { %4734 = vpow2.f32 %v2697_v9  ;;  %v2452_v16 = vsel %vm2424_vm0, %v4725_v31, 0.0  ;;  %v2461_v33 = vpack.c.bf16 %v4725_v31, %v4723_v6  ;;  %3608 = vmatprep.subr.bf16.mxu0 %v4550_v40  ;;  %v4584_v6 = vld [vmem:[#allocation13 + $0x120] ss:$16 sps:$4 sm:$0xff]   ;;  %v4592_v9 = vld [vmem:[#allocation13 + $0x144] ss:$16 sps:$4 sm:$0xff]  }
 0x4a5   : > { %v4727_v29 = vpop.eup %4726  ;;  %v2699_v18 = vmul.f32 1.442695, %v2692_v15  ;;  %2453 = vadd.xlane.f32.xlu0 %v2452_v16  ;;  %3609 = vmatpush1.bf16.msra.mxu0 %v4548_v42  ;;  %v4590_v14 = vld [vmem:[#allocation13 + $0x140] ss:$16 sps:$4 sm:$0xff]   ;;  %v4593_v31 = vld [vmem:[#allocation13 + $0x148] ss:$16 sps:$4 sm:$0xff]  }
 0x4a6   : > { %4366 = vmatprep.mubr.msk.bf16.mxu1 %vm2424_vm0, %v2461_v33  ;;  %v2455_v36 = vsel %vm2424_vm0, %v4727_v29, 0.0  ;;  %3610 = vmatprep.subr.bf16.mxu0 %v4556_v44  ;;  %v4598_v15 = vld [vmem:[#allocation13 + $0x164] ss:$16 sps:$4 sm:$0xff]   ;;  %v4601_v16 = vld [vmem:[#allocation13 + $0x16c] ss:$16 sps:$4 sm:$0xff]  }
 0x4a7   : > { %4736 = vpow2.f32 %v2699_v18  ;;  %2456 = vadd.xlane.f32.xlu1 %v2455_v36  ;;  %v4596_v33 = vld [vmem:[#allocation13 + $0x160] ss:$16 sps:$4 sm:$0xff]   ;;  %v4604_v18 = vld [vmem:[#allocation13 + $0x184] ss:$16 sps:$4 sm:$0xff]   ;;  %v4607_v36 = vld [vmem:[#allocation13 + $0x18c] ss:$16 sps:$4 sm:$0xff]  }
 0x4a9   : > { %v4729_v17 = vpop.eup %4728  ;;  %3611 = vmatpush1.bf16.msra.mxu0 %v4554_v46 }
 0x4aa   : > { %v4731_v19 = vpop.eup %4730  ;;  %v2458_v21 = vsel %vm2424_vm0, %v4729_v17, 0.0  ;;  %v2462_v13 = vpack.c.bf16 %v4729_v17, %v4727_v29  ;;  %3612 = vmatprep.subr.bf16.mxu0 %v4562_v49  ;;  %v4599_v29 = vld [vmem:[#allocation13 + $0x168] ss:$16 sps:$4 sm:$0xff]   ;;  %v4602_v17 = vld [vmem:[#allocation13 + $0x180] ss:$16 sps:$4 sm:$0xff]  }
 0x4ab   : > { %2459 = vadd.xlane.f32.xlu0 %v2458_v21  ;;  %v2701_v54 = vsel %vm2424_vm0, %v4731_v19, 0.0  ;;  %v4610_v21 = vld [vmem:[#allocation13 + $0x1a4] ss:$16 sps:$4 sm:$0xff]  }
 0x4ac   : > { %2702 = vadd.xlane.f32.xlu1 %v2701_v54  ;;  %4367 = vmatmul.mubr.msk.bf16.vlgmr.msra.gmra.mrb[8].mxu1 %vm2424_vm0, %v2462_v13  ;;  %v4613_v13 = vld [vmem:[#allocation13 + $0x1ac] ss:$16 sps:$4 sm:$0xff]   ;;  %v4608_v54 = vld [vmem:[#allocation13 + $0x1a0] ss:$16 sps:$4 sm:$0xff]  }
 0x4ad   : > { %v4733_v12 = vpop.eup %4732  ;;  %4377 = vmatpush3.bf16.msra.mxu1 %v5496_v30  ;;  %v4533_v30 = vld [vmem:[#allocation13 + $0x8] ss:$16 sps:$4 sm:$0xff]   ;;  %3613 = vmatpush1.bf16.msra.mxu0 %v4560_v51 }
 0x4ae   : > { %v4735_v22 = vpop.eup %4734  ;;  %v2704_v23 = vsel %vm2424_vm0, %v4733_v12, 0.0  ;;  %v2713_v24 = vpack.c.bf16 %v4733_v12, %v4731_v19  ;;  %3688 = vmatprep.subr.bf16.mxu1 %v4535_v60  ;;  %3614 = vmatprep.subr.bf16.mxu0 %v4568_v58  ;;  %v4605_v19 = vld [vmem:[#allocation13 + $0x188] ss:$16 sps:$4 sm:$0xff]  }
 0x4af   : > { %2705 = vadd.xlane.f32.xlu0 %v2704_v23  ;;  %v2707_v53 = vsel %vm2424_vm0, %v4735_v22, 0.0  ;;  %v4611_v12 = vld [vmem:[#allocation13 + $0x1a8] ss:$16 sps:$4 sm:$0xff]   ;;  %v4619_v23 = vld [vmem:[#allocation13 + $0x1cc] ss:$16 sps:$4 sm:$0xff]  }
 0x4b0   : > { %2708 = vadd.xlane.f32.xlu1 %v2707_v53  ;;  %4378 = vmatprep.mubr.msk.bf16.mxu1 %vm2424_vm0, %v2713_v24  ;;  %v4614_v24 = vld [vmem:[#allocation13 + $0x1c0] ss:$16 sps:$4 sm:$0xff]   ;;  %v4617_v53 = vld [vmem:[#allocation13 + $0x1c8] ss:$16 sps:$4 sm:$0xff]  }
 0x4b1   : > { %v4737_v7 = vpop.eup %4736  ;;  %3615 = vmatpush1.bf16.msra.mxu0 %v4566_v57 }
 0x4b2   : > { %v2710_v11 = vsel %vm2424_vm0, %v4737_v7, 0.0  ;;  %v2714_v25 = vpack.c.bf16 %v4737_v7, %v4735_v22  ;;  %3616 = vmatprep.subr.bf16.mxu0 %v4574_v62  ;;  %v4616_v22 = vld [vmem:[#allocation13 + $0x1c4] ss:$16 sps:$4 sm:$0xff]  }
 0x4b3   : > { %2711 = vadd.xlane.f32.xlu0 %v2710_v11  ;;  %v4622_v7 = vld [vmem:[#allocation13 + $0x1e4] ss:$16 sps:$4 sm:$0xff]   ;;  %v4625_v11 = vld [vmem:[#allocation13 + $0x1ec] ss:$16 sps:$4 sm:$0xff]  }
 0x4b4   : > { %4379 = vmatmul.mubr.msk.bf16.vlgmr.msra.gmra.mrb[12].mxu1 %vm2424_vm0, %v2714_v25  ;;  %v4620_v25 = vld [vmem:[#allocation13 + $0x1e0] ss:$16 sps:$4 sm:$0xff]  }
 0x4b5   : > { %3689 = vmatpush1.bf16.msra.mxu1 %v4533_v30  ;;  %3617 = vmatpush1.bf16.msra.mxu0 %v4572_v0  ;;  %v4631_v30 = vld [vmem:[#allocation13 + $0x20c] ss:$16 sps:$4 sm:$0xff]  }
 0x4b6   : > { %3690 = vmatprep.subr.bf16.mxu1 %v4541_v32  ;;  %3618 = vmatprep.subr.bf16.mxu0 %v4580_v28 }
 0x4b9   : > { %3691 = vmatpush1.bf16.msra.mxu1 %v4539_v35  ;;  %3619 = vmatpush1.bf16.msra.mxu0 %v4578_v48 }
 0x4ba   : > { %3692 = vmatprep.subr.bf16.mxu1 %v4547_v37  ;;  %3620 = vmatprep.subr.bf16.mxu0 %v4586_v4  ;;  %v5050_v37 = vmov 1966171168  }
 0x4bb   : > { %v2527_v38 = vunpack.c.l.s4 %v5050_v37  ;;  %v4652_v37 = vld [vmem:[#allocation13 + $0x284] ss:$16 sps:$4 sm:$0xff]  }
 0x4bd   : > { %3693 = vmatpush1.bf16.msra.mxu1 %v4545_v39  ;;  %3621 = vmatpush1.bf16.msra.mxu0 %v4584_v6 }
 0x4be   : > { %3694 = vmatprep.subr.bf16.mxu1 %v4553_v41  ;;  %3622 = vmatprep.subr.bf16.mxu0 %v4592_v9  ;;  %v2528_v41 = vunpack.c.0.s8 %v2527_v38  ;;  %v4655_v38 = vld [vmem:[#allocation13 + $0x28c] ss:$16 sps:$4 sm:$0xff]  }
 0x4c0   : > { %v2531_v46 = vsub.s32 %v2528_v41, %v5414_v20  ;;  %v4658_v41 = vld [vmem:[#allocation13 + $0x2a4] ss:$16 sps:$4 sm:$0xff]  }
 0x4c1   : > { %3695 = vmatpush1.bf16.msra.mxu1 %v4551_v43  ;;  %3623 = vmatpush1.bf16.msra.mxu0 %v4590_v14 }
 0x4c2   : > { %3696 = vmatprep.subr.bf16.mxu1 %v4559_v45  ;;  %3624 = vmatprep.subr.bf16.mxu0 %v4598_v15  ;;  %v4626_v15 = vld [vmem:[#allocation13 + $0x200] ss:$16 sps:$4 sm:$0xff]  }
 0x4c5   : > { %3697 = vmatpush1.bf16.msra.mxu1 %v4557_v47  ;;  %3625 = vmatpush1.bf16.msra.mxu0 %v4596_v33 }
 0x4c6   : > { %3698 = vmatprep.subr.bf16.mxu1 %v4565_v50  ;;  %3626 = vmatprep.subr.bf16.mxu0 %v4604_v18 }
 0x4c9   : > { %3699 = vmatpush1.bf16.msra.mxu1 %v4563_v52  ;;  %3627 = vmatpush1.bf16.msra.mxu0 %v4602_v17  ;;  %v4637_v17 = vld [vmem:[#allocation13 + $0x22c] ss:$16 sps:$4 sm:$0xff]  }
 0x4ca   : > { %3700 = vmatprep.subr.bf16.mxu1 %v4571_v55  ;;  %3628 = vmatprep.subr.bf16.mxu0 %v4610_v21 }
 0x4cd   : > { %3701 = vmatpush1.bf16.msra.mxu1 %v4569_v59  ;;  %3629 = vmatpush1.bf16.msra.mxu0 %v4608_v54 }
 0x4ce   : > { %3702 = vmatprep.subr.bf16.mxu1 %v4577_v63  ;;  %3630 = vmatprep.subr.bf16.mxu0 %v4616_v22  ;;  %v4632_v22 = vld [vmem:[#allocation13 + $0x220] ss:$16 sps:$4 sm:$0xff]  }
 0x4d1   : > { %3703 = vmatpush1.bf16.msra.mxu1 %v4575_v1  ;;  %3631 = vmatpush1.bf16.msra.mxu0 %v4614_v24 }
 0x4d2   : > { %3704 = vmatprep.subr.bf16.mxu1 %v4583_v2  ;;  %3632 = vmatprep.subr.bf16.mxu0 %v4622_v7  ;;  %v4640_v7 = vld [vmem:[#allocation13 + $0x244] ss:$16 sps:$4 sm:$0xff]  }
 0x4d5   : > { %3705 = vmatpush1.bf16.msra.mxu1 %v4581_v3  ;;  %3633 = vmatpush1.bf16.msra.mxu0 %v4620_v25 }
 0x4d6   : > { %3706 = vmatprep.subr.bf16.mxu1 %v4589_v5  ;;  %3645 = vmatprep.subr.bf16.mxu0 %v4628_v27 }
 0x4d9   : > { %3707 = vmatpush1.bf16.msra.mxu1 %v4587_v8 }
 0x4da   : > { %3708 = vmatprep.subr.bf16.mxu1 %v4595_v10 }
 0x4dd   : > { %3709 = vmatpush1.bf16.msra.mxu1 %v4593_v31 }
 0x4de   : > { %3710 = vmatprep.subr.bf16.mxu1 %v4601_v16  ;;  %v4629_v16 = vld [vmem:[#allocation13 + $0x208] ss:$16 sps:$4 sm:$0xff]  }
 0x4e1   : > { %3711 = vmatpush1.bf16.msra.mxu1 %v4599_v29 }
 0x4e2   : > { %3712 = vmatprep.subr.bf16.mxu1 %v4607_v36  ;;  %v4634_v36 = vld [vmem:[#allocation13 + $0x224] ss:$16 sps:$4 sm:$0xff]  }
 0x4e5   : > { %3713 = vmatpush1.bf16.msra.mxu1 %v4605_v19 }
 0x4e6   : > { %3714 = vmatprep.subr.bf16.mxu1 %v4613_v13 }
 0x4e9   : > { %3715 = vmatpush1.bf16.msra.mxu1 %v4611_v12 }
 0x4ea   : > { %3716 = vmatprep.subr.bf16.mxu1 %v4619_v23  ;;  %v4635_v23 = vld [vmem:[#allocation13 + $0x228] ss:$16 sps:$4 sm:$0xff]  }
 0x4ed   : > { %3717 = vmatpush1.bf16.msra.mxu1 %v4617_v53 }
 0x4ee   : > { %3718 = vmatprep.subr.bf16.mxu1 %v4625_v11  ;;  %v4643_v11 = vld [vmem:[#allocation13 + $0x24c] ss:$16 sps:$4 sm:$0xff]  }
 0x4f1   : > { %3719 = vmatpush1.bf16.msra.mxu1 %v4623_v26 }
 0x4f2   : > { %3731 = vmatprep.subr.bf16.mxu1 %v4631_v30  ;;  %v4638_v30 = vld [vmem:[#allocation13 + $0x240] ss:$16 sps:$4 sm:$0xff]  }
 0x530   : > { %v2451_v60 = vpop.xlane.xlu1 %2450 }
 0x532   : > { %v2454_v61 = vpop.xlane.xlu0 %2453 }
 0x534   : > { %v2457_v32 = vpop.xlane.xlu1 %2456 }
 0x535   : > { %4738 = vrcp.f32 %v2457_v32  ;;  %v4646_v32 = vld [vmem:[#allocation13 + $0x264] ss:$16 sps:$4 sm:$0xff]  }
 0x536   : > { %4740 = vrcp.f32 %v2451_v60 }
 0x538   : > { %v2460_v34 = vpop.xlane.xlu0 %2459 }
 0x539   : > { %v2703_v35 = vpop.xlane.xlu1 %2702  ;;  %4742 = vrcp.f32 %v2460_v34  ;;  %v4649_v34 = vld [vmem:[#allocation13 + $0x26c] ss:$16 sps:$4 sm:$0xff]  }
 0x53a   : > { %4744 = vrcp.f32 %v2454_v61  ;;  %v4641_v61 = vld [vmem:[#allocation13 + $0x248] ss:$16 sps:$4 sm:$0xff]  }
 0x53c   : > { %v2706_v56 = vpop.xlane.xlu0 %2705 }
 0x53d   : > { %v2709_v39 = vpop.xlane.xlu1 %2708 }
 0x53e   : > { %4746 = vrcp.f32 %v2709_v39  ;;  %v4650_v39 = vld [vmem:[#allocation13 + $0x280] ss:$16 sps:$4 sm:$0xff]  }
 0x53f   : > { %4748 = vrcp.f32 %v2703_v35  ;;  %v4739_v42 = vpop.eup %4738  ;;  %v4644_v35 = vld [vmem:[#allocation13 + $0x260] ss:$16 sps:$4 sm:$0xff]  }
 0x540   : > { %v2712_v40 = vpop.xlane.xlu0 %2711  ;;  %v4741_v44 = vpop.eup %4740 }
 0x541   : > { %4750 = vrcp.f32 %v2712_v40  ;;  %v4653_v40 = vld [vmem:[#allocation13 + $0x288] ss:$16 sps:$4 sm:$0xff]  }
 0x542   : > { %4752 = vrcp.f32 %v2706_v56  ;;  %v4647_v56 = vld [vmem:[#allocation13 + $0x268] ss:$16 sps:$4 sm:$0xff]  }
 0x543   : > { %v4743_v49 = vpop.eup %4742 }
 0x544   : > { %v4745_v52 = vpop.eup %4744 }
 0x548   : > { %v4747_v2 = vpop.eup %4746 }
 0x549   : > { %v4749_v5 = vpop.eup %4748 }
 0x54b   : > { %v4751_v8 = vpop.eup %4750 }
 0x54c   : > { %v4753_v33 = vpop.eup %4752 }
 0x57f   : > { %v4368_v43 = vpop.f32.mrb[8].mxu1 }
 0x580   : > { %v2524_v45 = vmul.f32 %v4739_v42, %v4368_v43  ;;  %v2503_v47 = vpop.f32.mrb[9].mxu1  ;;  %v4661_v42 = vld [vmem:[#allocation13 + $0x2ac] ss:$16 sps:$4 sm:$0xff]   ;;  %v4656_v43 = vld [vmem:[#allocation13 + $0x2a0] ss:$16 sps:$4 sm:$0xff]  }
 0x581   : > { %v2522_v50 = vmul.f32 %v4741_v44, %v2503_v47  ;;  %v4369_v51 = vpop.f32.mrb[10].mxu1  ;;  %v4659_v44 = vld [vmem:[#allocation13 + $0x2a8] ss:$16 sps:$4 sm:$0xff]   ;;  %v4662_v47 = vld [vmem:[#allocation13 + $0x2c0] ss:$16 sps:$4 sm:$0xff]  }
 0x582   : > { %v2525_v58 = vmul.f32 %v4743_v49, %v4369_v51  ;;  %v2506_v55 = vpop.f32.mrb[11].mxu1  ;;  %v2546_v59 = vrot.slane %v2524_v45, %v2531_v46  ;;  %v4664_v45 = vld [vmem:[#allocation13 + $0x2c4] ss:$16 sps:$4 sm:$0xff]   ;;  %v4665_v49 = vld [vmem:[#allocation13 + $0x2c8] ss:$16 sps:$4 sm:$0xff]  }
 0x583   : > { %v2523_v57 = vmul.f32 %v4745_v52, %v2506_v55  ;;  %v2532_v63 = vrot.slane %v2522_v50, %v2531_v46  ;;  %v4670_v50 = vld [vmem:[#allocation13 + $0x2e4] ss:$16 sps:$4 sm:$0xff]   ;;  %v4673_v51 = vld [vmem:[#allocation13 + $0x2ec] ss:$16 sps:$4 sm:$0xff]   ;;  %v4668_v52 = vld [vmem:[#allocation13 + $0x2e0] ss:$16 sps:$4 sm:$0xff]  }
 0x584   : > { %v2553_v62 = vrot.slane %v2525_v58, %v2531_v46  ;;  %v4671_v58 = vld [vmem:[#allocation13 + $0x2e8] ss:$16 sps:$4 sm:$0xff]   ;;  %v4676_v55 = vld [vmem:[#allocation13 + $0x304] ss:$16 sps:$4 sm:$0xff]  }
 0x585   : > { %v2539_v0 = vrot.slane %v2523_v57, %v2531_v46  ;;  %v4679_v57 = vld [vmem:[#allocation13 + $0x30c] ss:$16 sps:$4 sm:$0xff]  }
 0x586   : > { %v2812_v1 = vcombine.low %v2546_v59, %v2553_v62  ;;  %v2813_v28 = vcombine.high %v2546_v59, %v2553_v62  ;;  %v4674_v59 = vld [vmem:[#allocation13 + $0x300] ss:$16 sps:$4 sm:$0xff]   ;;  %v4677_v62 = vld [vmem:[#allocation13 + $0x308] ss:$16 sps:$4 sm:$0xff]  }
 0x587   : > { %v2810_v48 = vcombine.low %v2532_v63, %v2539_v0  ;;  %v2811_v3 = vcombine.high %v2532_v63, %v2539_v0  ;;  %v4380_v4 = vpop.f32.mrb[12].mxu1  ;;  %v4682_v63 = vld [vmem:[#allocation13 + $0x324] ss:$16 sps:$4 sm:$0xff]   ;;  %v4685_v0 = vld [vmem:[#allocation13 + $0x32c] ss:$16 sps:$4 sm:$0xff]  }
 0x588   : > { %v2776_v20 = vmul.f32 %v4747_v2, %v4380_v4  ;;  %v2755_v6 = vpop.f32.mrb[13].mxu1  ;;  %v4688_v2 = vld [vmem:[#allocation13 + $0x344] ss:$16 sps:$4 sm:$0xff]   ;;  %v4689_v4 = vld [vmem:[#allocation13 + $0x348] ss:$16 sps:$4 sm:$0xff]  }
 0x589   : > { %v2830_v9 = vpack.c.bf16 %v2812_v1, %v2810_v48  ;;  %v2774_v10 = vmul.f32 %v4749_v5, %v2755_v6  ;;  %v4381_v14 = vpop.f32.mrb[14].mxu1  ;;  %v2831_v31 = vpack.c.bf16 %v2813_v28, %v2811_v3  ;;  %v4680_v1 = vld [vmem:[#allocation13 + $0x320] ss:$16 sps:$4 sm:$0xff]   ;;  %v4683_v28 = vld [vmem:[#allocation13 + $0x328] ss:$16 sps:$4 sm:$0xff]  }
 0x58a   : > { %v2777_v29 = vmul.f32 %v4751_v8, %v4381_v14  ;;  %v2758_v18 = vpop.f32.mrb[15].mxu1  ;;  %v2798_v21 = vrot.slane %v2776_v20, %v2531_v46  ;;  %v4691_v48 = vld [vmem:[#allocation13 + $0x34c] ss:$16 sps:$4 sm:$0xff]   ;;  %v4686_v3 = vld [vmem:[#allocation13 + $0x340] ss:$16 sps:$4 sm:$0xff]  }
 0x58b   : > { %v2775_v19 = vmul.f32 %v4753_v33, %v2758_v18  ;;  %3634 = vmatprep.mubr.bf16.mxu0 %v2831_v31  ;;  %3720 = vmatprep.mubr.bf16.mxu1 %v2831_v31  ;;  %v2784_v54 = vrot.slane %v2774_v10, %v2531_v46  ;;  %v4694_v5 = vld [vmem:[#allocation13 + $0x364] ss:$16 sps:$4 sm:$0xff]   ;;  %v4697_v20 = vld [vmem:[#allocation13 + $0x36c] ss:$16 sps:$4 sm:$0xff]   ;;  %v4692_v6 = vld [vmem:[#allocation13 + $0x360] ss:$16 sps:$4 sm:$0xff]  }
 0x58c   : > { %v2805_v13 = vrot.slane %v2777_v29, %v2531_v46  ;;  %3635 = vmatmul.mubr.bf16.vlgmr.msra.gmra.mrb[16].mxu0 %v2830_v9  ;;  %3721 = vmatmul.mubr.bf16.vlgmr.msra.gmra.mrb[16].mxu1 %v2830_v9  ;;  %v4695_v8 = vld [vmem:[#allocation13 + $0x368] ss:$16 sps:$4 sm:$0xff]   ;;  %v4700_v9 = vld [vmem:[#allocation13 + $0x384] ss:$16 sps:$4 sm:$0xff]   ;;  %v4703_v10 = vld [vmem:[#allocation13 + $0x38c] ss:$16 sps:$4 sm:$0xff]  }
 0x58d   : > { %v2791_v12 = vrot.slane %v2775_v19, %v2531_v46  ;;  %3646 = vmatpush1.bf16.msra.mxu0 %v4626_v15  ;;  %3732 = vmatpush1.bf16.msra.mxu1 %v4629_v16  ;;  %v4667_v46 = vld [vmem:[#allocation13 + $0x2cc] ss:$16 sps:$4 sm:$0xff]   ;;  %v4698_v14 = vld [vmem:[#allocation13 + $0x380] ss:$16 sps:$4 sm:$0xff]   ;;  %v4701_v31 = vld [vmem:[#allocation13 + $0x388] ss:$16 sps:$4 sm:$0xff]  }
 0x58e   : > { %v2824_v24 = vcombine.low %v2798_v21, %v2805_v13  ;;  %v2825_v53 = vcombine.high %v2798_v21, %v2805_v13  ;;  %3647 = vmatprep.subr.bf16.mxu0 %v4634_v36  ;;  %3733 = vmatprep.subr.bf16.mxu1 %v4637_v17  ;;  %v4706_v15 = vld [vmem:[#allocation13 + $0x3a4] ss:$16 sps:$4 sm:$0xff]   ;;  %v4709_v16 = vld [vmem:[#allocation13 + $0x3ac] ss:$16 sps:$4 sm:$0xff]   ;;  %v4704_v33 = vld [vmem:[#allocation13 + $0x3a0] ss:$16 sps:$4 sm:$0xff]  }
 0x58f   : > { %v2822_v25 = vcombine.low %v2784_v54, %v2791_v12  ;;  %v2823_v26 = vcombine.high %v2784_v54, %v2791_v12  ;;  %v4707_v29 = vld [vmem:[#allocation13 + $0x3a8] ss:$16 sps:$4 sm:$0xff]   ;;  %v4712_v18 = vld [vmem:[#allocation13 + $0x3c4] ss:$16 sps:$4 sm:$0xff]   ;;  %v4715_v36 = vld [vmem:[#allocation13 + $0x3cc] ss:$16 sps:$4 sm:$0xff]  }
 0x590   : > { %v4710_v17 = vld [vmem:[#allocation13 + $0x3c0] ss:$16 sps:$4 sm:$0xff]   ;;  %v4713_v19 = vld [vmem:[#allocation13 + $0x3c8] ss:$16 sps:$4 sm:$0xff]   ;;  %v4718_v21 = vld [vmem:[#allocation13 + $0x3e4] ss:$16 sps:$4 sm:$0xff]  }
 0x591   : > { %v5521_v27 = vpack.c.bf16 %v2824_v24, %v2822_v25  ;;  %3648 = vmatpush1.bf16.msra.mxu0 %v4632_v22  ;;  %3734 = vmatpush1.bf16.msra.mxu1 %v4635_v23  ;;  %v2833_v60 = vpack.c.bf16 %v2825_v53, %v2823_v26  ;;  %v4721_v13 = vld [vmem:[#allocation13 + $0x3ec] ss:$16 sps:$4 sm:$0xff]   ;;  %v4716_v54 = vld [vmem:[#allocation13 + $0x3e0] ss:$16 sps:$4 sm:$0xff]   ;;  %v4719_v12 = vld [vmem:[#allocation13 + $0x3e8] ss:$16 sps:$4 sm:$0xff]  }
 0x592   : > { %3649 = vmatprep.subr.bf16.mxu0 %v4640_v7  ;;  %3735 = vmatprep.subr.bf16.mxu1 %v4643_v11 }
 0x593   : > { %3677 = vmatprep.mubr.bf16.mxu0 %v2833_v60  ;;  %3763 = vmatprep.mubr.bf16.mxu1 %v2833_v60 }
 0x595   : > { %3650 = vmatpush1.bf16.msra.mxu0 %v4638_v30  ;;  %3736 = vmatpush1.bf16.msra.mxu1 %v4641_v61 }
 0x596   : > { %3651 = vmatprep.subr.bf16.mxu0 %v4646_v32  ;;  %3737 = vmatprep.subr.bf16.mxu1 %v4649_v34 }
 0x599   : > { %3652 = vmatpush1.bf16.msra.mxu0 %v4644_v35  ;;  %3738 = vmatpush1.bf16.msra.mxu1 %v4647_v56 }
 0x59a   : > { %3653 = vmatprep.subr.bf16.mxu0 %v4652_v37  ;;  %3739 = vmatprep.subr.bf16.mxu1 %v4655_v38 }
 0x59d   : > { %3654 = vmatpush1.bf16.msra.mxu0 %v4650_v39  ;;  %3740 = vmatpush1.bf16.msra.mxu1 %v4653_v40 }
 0x59e   : > { %3655 = vmatprep.subr.bf16.mxu0 %v4658_v41  ;;  %3741 = vmatprep.subr.bf16.mxu1 %v4661_v42 }
 0x5a1   : > { %3656 = vmatpush1.bf16.msra.mxu0 %v4656_v43  ;;  %3742 = vmatpush1.bf16.msra.mxu1 %v4659_v44 }
 0x5a2   : > { %3657 = vmatprep.subr.bf16.mxu0 %v4664_v45  ;;  %3743 = vmatprep.subr.bf16.mxu1 %v4667_v46 }
 0x5a5   : > { %3658 = vmatpush1.bf16.msra.mxu0 %v4662_v47  ;;  %3744 = vmatpush1.bf16.msra.mxu1 %v4665_v49 }
 0x5a6   : > { %3659 = vmatprep.subr.bf16.mxu0 %v4670_v50  ;;  %3745 = vmatprep.subr.bf16.mxu1 %v4673_v51 }
 0x5a9   : > { %3660 = vmatpush1.bf16.msra.mxu0 %v4668_v52  ;;  %3746 = vmatpush1.bf16.msra.mxu1 %v4671_v58 }
 0x5aa   : > { %3661 = vmatprep.subr.bf16.mxu0 %v4676_v55  ;;  %3747 = vmatprep.subr.bf16.mxu1 %v4679_v57 }
 0x5ad   : > { %3662 = vmatpush1.bf16.msra.mxu0 %v4674_v59  ;;  %3748 = vmatpush1.bf16.msra.mxu1 %v4677_v62 }
 0x5ae   : > { %3663 = vmatprep.subr.bf16.mxu0 %v4682_v63  ;;  %3749 = vmatprep.subr.bf16.mxu1 %v4685_v0 }
 0x5b1   : > { %3664 = vmatpush1.bf16.msra.mxu0 %v4680_v1  ;;  %3750 = vmatpush1.bf16.msra.mxu1 %v4683_v28 }
 0x5b2   : > { %3665 = vmatprep.subr.bf16.mxu0 %v4688_v2  ;;  %3751 = vmatprep.subr.bf16.mxu1 %v4691_v48 }
 0x5b5   : > { %3666 = vmatpush1.bf16.msra.mxu0 %v4686_v3  ;;  %3752 = vmatpush1.bf16.msra.mxu1 %v4689_v4 }
 0x5b6   : > { %3667 = vmatprep.subr.bf16.mxu0 %v4694_v5  ;;  %3753 = vmatprep.subr.bf16.mxu1 %v4697_v20 }
 0x5b9   : > { %3668 = vmatpush1.bf16.msra.mxu0 %v4692_v6  ;;  %3754 = vmatpush1.bf16.msra.mxu1 %v4695_v8 }
 0x5ba   : > { %3669 = vmatprep.subr.bf16.mxu0 %v4700_v9  ;;  %3755 = vmatprep.subr.bf16.mxu1 %v4703_v10 }
 0x5bd   : > { %3670 = vmatpush1.bf16.msra.mxu0 %v4698_v14  ;;  %3756 = vmatpush1.bf16.msra.mxu1 %v4701_v31 }
 0x5be   : > { %3671 = vmatprep.subr.bf16.mxu0 %v4706_v15  ;;  %3757 = vmatprep.subr.bf16.mxu1 %v4709_v16 }
 0x5c1   : > { %3672 = vmatpush1.bf16.msra.mxu0 %v4704_v33  ;;  %3758 = vmatpush1.bf16.msra.mxu1 %v4707_v29 }
 0x5c2   : > { %3673 = vmatprep.subr.bf16.mxu0 %v4712_v18  ;;  %3759 = vmatprep.subr.bf16.mxu1 %v4715_v36 }
 0x5c5   : > { %3674 = vmatpush1.bf16.msra.mxu0 %v4710_v17  ;;  %3760 = vmatpush1.bf16.msra.mxu1 %v4713_v19 }
 0x5c6   : > { %3675 = vmatprep.subr.bf16.mxu0 %v4718_v21  ;;  %3761 = vmatprep.subr.bf16.mxu1 %v4721_v13 }
 0x5c9   : > { %3676 = vmatpush1.bf16.msra.mxu0 %v4716_v54  ;;  %3762 = vmatpush1.bf16.msra.mxu1 %v4719_v12 }
 0x5cc   : > { %3678 = vmatmul.mubr.bf16.vlgmr.msra.gmra.mrb[16].mxu0 %v5521_v27  ;;  %3764 = vmatmul.mubr.bf16.vlgmr.msra.gmra.mrb[16].mxu1 %v5521_v27 }
 0x69f   : > { %v3679_v22 = vpop.f32.mrb[16].mxu0  ;;  %v3765_v23 = vpop.f32.mrb[16].mxu1 }
 0x6a0   : > { %3774 = vst [vmem:[%s383_s19] sm:$0xff] %v3679_v22  ;;  %3776 = vst [vmem:[%s383_s19 + $0x10] sm:$0xff] %v3765_v23  ;;  %v3681_v24 = vpop.f32.mrb[17].mxu0  ;;  %v3767_v53 = vpop.f32.mrb[17].mxu1 }
 0x6a1   : > { %3775 = vst [vmem:[%s383_s19 + $0x8] sm:$0xff] %v3681_v24  ;;  %3777 = vst [vmem:[%s383_s19 + $0x18] sm:$0xff] %v3767_v53  ;;  %v3683_v7 = vpop.f32.mrb[18].mxu0  ;;  %v3769_v11 = vpop.f32.mrb[18].mxu1 }
 0x6a2   : > { %3778 = vst [vmem:[%s383_s19 + $0x20] sm:$0xff] %v3683_v7  ;;  %3780 = vst [vmem:[%s383_s19 + $0x30] sm:$0xff] %v3769_v11  ;;  %v3685_v25 = vpop.f32.mrb[19].mxu0  ;;  %v3771_v26 = vpop.f32.mrb[19].mxu1 }
 0x6a3   : > { %3779 = vst [vmem:[%s383_s19 + $0x28] sm:$0xff] %v3685_v25  ;;  %3781 = vst [vmem:[%s383_s19 + $0x38] sm:$0xff] %v3771_v26 }
 0x6a4   : > { %4968 = shalt.err (!%p4965_p8)
}
 0x6a5   : > { %s4969_s18 = scalar_lea.hbm %s5532_s13, 1024  ;;  %s4973_s23 = scalar_lea.hbm %s5583_s7, 2048 }
 0x6a6   : > { %p4970_p4 = scmp.ne.s32.totalorder %s5532_s13, %s4969_s18  ;;  %p4974_p3 = scmp.lt.u32.totalorder %s5532_s13, %s5583_s7 }
 0x6a7   : > { %p4975_p5 = scmp.lt.u32.totalorder %s4973_s23, %s4969_s18  ;;  %p4977_p6 = scmp.lt.u32.totalorder %s4969_s18, %s5532_s13 }
 0x6a8   : > { %p4971_p10 = pnand %p4970_p4, %p5611_p9 }
 0x6a9   : > { %p4976_p7 = por %p4975_p5, %p4974_p3 }
 0x6aa   : > { %p4972_p11 = pneg %p4971_p10 }
 0x6ab   : > { %p4978_p12 = por %p4977_p6, %p4976_p7 }
 0x6ad   : > { %p4979_p1 = pnand %p4978_p12, %p4972_p11 }
 0x6af   : > { %4982 = shalt.err (!%p4979_p1)
}
 0x6b0   : > { %s5052_s20 = smov 512   ;;  %s5053_s10 = smov 32  }
 0x6b1   : > { %4432 = dma.vmem_to_hbm [thread:$0]  (%p5611_p9), %s5527_s1, 1024, %s5532_s13, %s3783_s30, %s5052_s20, %s5052_s20, %s5053_s10  }
 0x6b2 PF: > { %s3811_s12 = sand.u32 1, %s5021_s24   ;;  %p5612_p13 = scmp.ne.s32.totalorder %s5602_s9, 0 }
 0x6b3   : > { %p5613_p0 = scmp.ge.s32.totalorder %s5033_s27, 2  ;;  %s3812_s15 = scalar_lea.sflag [#allocation4], %s3811_s12 }
 0x6b5   : > { %p4458_p2 = pnand %p5613_p0, %p5612_p13 }
 0x6b7   : > { %5016 = dma.done.wait (!%p4458_p2), %s3812_s15, 1024  }
 0x6b8   : > { %5018 = vsyncadd (!%p4458_p2), %s3812_s15, 4294966272  ;;  %p23_p8 = scmp.ge.s32.totalorder %s5285_s14, 4   ;;  %s5614_s24 = smov %s5025_s25 }
 0x6b9   : > { %s5615_s25 = smov %s5029_s26  ;;  %s5616_s26 = smov %s5296_s11 }
 0x6ba   : > { %s5617_s27 = smov %s5285_s14  ;;  %25 = sbr.rel (!%p23_p8) target bundleno = 10 (0xa), region = 117 }
 0x6c1   :  { %3817 = vsyncpa [#allocation3], 1 }
 0x6c2   :  { %3819 = vsyncpa [#allocation3 + $0x1], 1 }
 0x6c3   :  { %3820 = vsyncpa [#allocation6], 1 }
 0x6c4   :  { %3821 = vsyncpa [#allocation9], 1 }
 0x6c5   :  { %3822 = vsyncpa [#allocation12], 1 }
 0x6c6   :  { %3823 = vsyncpa [#allocation4], 1 }
 0x6c7   :  { %3825 = vsyncpa [#allocation4 + $0x1], 1 }

</bundles_post_ra>
